<compile_context>
chip_gen: v7x
topology: tpu7x:2x2x1
jax: 0.10.0
libtpu: 0.0.40
codegen_flags: <defaults>
</compile_context>

<pallas_src>
import functools

import jax
import jax.numpy as jnp
from jax.experimental import pallas as pl
from jax.experimental.pallas import tpu as pltpu


def convrelu_kernel(x_ref, w_ref, b_ref, o_ref):
    # x_ref: (1, H, W, Cin)   input tile (feed dtype, bf16 by default)
    # w_ref: (Cout, 9*Cin)    conv weight, layout (cout, (kh*3+kw)*cin)
    # b_ref: (Cout, 1)        bias (f32)
    # o_ref: (1, Cout, H*W)   output tile (f32), H*W on lanes
    _, H, W, Cin = x_ref.shape

    x = x_ref[0]  # (H, W, Cin)

    # Build the 1-pixel zero halo in VMEM (ReLU comes after the conv, so the
    # halo is plain zeros).  No wrapper-side jnp.pad HBM pass.
    zrow = jnp.zeros((1, W, Cin), dtype=x.dtype)
    zcol = jnp.zeros((H + 2, 1, Cin), dtype=x.dtype)
    xp = jnp.concatenate([zrow, x, zrow], axis=0)   # (H+2, W,   Cin)
    xp = jnp.concatenate([zcol, xp, zcol], axis=1)  # (H+2, W+2, Cin)

    # im2col tap slab: all 9 shifted windows gathered on the lane axis.
    # taps[y*W + x, (dy*3+dx)*Cin + ci] = xp[y+dy, x+dx, ci]
    taps = jnp.concatenate(
        [xp[dy:dy + H, dx:dx + W, :] for dy in range(3) for dx in range(3)],
        axis=-1,
    ).reshape(H * W, 9 * Cin)                       # (H*W, 9*Cin)

    # One MXU matmul, attention-score form: (Cout, 9Cin) x (H*W, 9Cin)^T
    # contracted on the minor dims -> (Cout, H*W), f32 accumulation.
    out_t = jax.lax.dot_general(
        w_ref[...], taps,
        dimension_numbers=(((1,), (1,)), ((), ())),
        preferred_element_type=jnp.float32,
    )                                               # (Cout, H*W)

    # Bias + ReLU in f32; single lane-dense store.
    o_ref[0] = jnp.maximum(out_t + b_ref[...], 0.0).astype(o_ref.dtype)


@functools.partial(jax.jit, static_argnames=("feed_dtype",))
def convrelu_forward(x_nchw, w, b, *, feed_dtype=jnp.bfloat16):
    """ConvRelu forward.

    x_nchw: (N, Cin, H, W) f32; w: (Cout, Cin, 3, 3); b: (Cout,).
    Returns (N, Cout, H, W) f32.
    """
    N, Cin, H, W = x_nchw.shape
    Cout = w.shape[0]

    # NCHW -> NHWC (channels on lanes for the tap gather); MXU feeds in
    # `feed_dtype`.  This is the only wrapper-side layout pass left.
    x = jnp.transpose(x_nchw, (0, 2, 3, 1)).astype(feed_dtype)

    # PyTorch (out, in, kh, kw) -> (out, kh, kw, in) -> (out, 9*in) so that
    # column (dy*3+dx)*Cin + ci matches the in-kernel tap slab ordering.
    w_t = jnp.transpose(w, (0, 2, 3, 1)).reshape(Cout, 9 * Cin).astype(feed_dtype)
    b_r = b.reshape(Cout, 1).astype(jnp.float32)

    feed_bytes = jnp.dtype(feed_dtype).itemsize
    vmem_est = (
        2 * H * W * Cin * feed_bytes              # input block (double-buffered)
        + 2 * Cout * 9 * Cin * feed_bytes         # weight block (double-buffered)
        + 2 * Cout * H * W * 4                    # output block (double-buffered)
        + (H + 2) * (W + 2) * Cin * feed_bytes    # padded halo copy
        + H * W * 9 * Cin * feed_bytes            # im2col tap slab
        + 2 * Cout * H * W * 4                    # f32 matmul result + relu temp
    )
    vmem_limit = int(min(64 * 1024 * 1024, max(32 * 1024 * 1024, 2 * vmem_est)))

    out_t = pl.pallas_call(
        convrelu_kernel,
        out_shape=jax.ShapeDtypeStruct((N, Cout, H * W), jnp.float32),
        grid_spec=pl.GridSpec(
            grid=(N,),
            in_specs=[
                pl.BlockSpec((1, H, W, Cin), lambda n: (n, 0, 0, 0)),
                pl.BlockSpec((Cout, 9 * Cin), lambda n: (0, 0)),
                pl.BlockSpec((Cout, 1), lambda n: (0, 0)),
            ],
            out_specs=pl.BlockSpec((1, Cout, H * W), lambda n: (n, 0, 0)),
        ),
        compiler_params=pltpu.CompilerParams(
            dimension_semantics=("parallel",),
            vmem_limit_bytes=vmem_limit,
        ),
    )(x, w_t, b_r)

    # (N, Cout, H*W) -> (N, Cout, H, W): pure metadata reshape, no HBM pass.
    return out_t.reshape(N, Cout, H, W)


def _reference_forward(x_nchw, w, b):
    """Pure-JAX f32 reference mirroring the PyTorch module."""
    h = jax.lax.conv_general_dilated(
        x_nchw, w, window_strides=(1, 1), padding=((1, 1), (1, 1)),
        dimension_numbers=("NCHW", "OIHW", "NCHW"),
    ) + b.reshape(1, -1, 1, 1)
    return jnp.maximum(h, 0.0)


if __name__ == "__main__":
    # Small shapes consistent with the module: batch=2, in_=4, out=8, spatial=16.
    N, Cin, Cout, H, W = 2, 4, 8, 16, 16

    key = jax.random.PRNGKey(0)
    kx, kw, kb = jax.random.split(key, 3)

    x = jax.random.normal(kx, (N, Cin, H, W), dtype=jnp.float32)
    w = 0.1 * jax.random.normal(kw, (Cout, Cin, 3, 3), dtype=jnp.float32)  # Conv2d(Cin, Cout, 3, padding=1)
    b = 0.1 * jax.random.normal(kb, (Cout,), dtype=jnp.float32)

    ref = _reference_forward(x, w, b)

    # Exactness check with f32 MXU feeds (same algorithm, tight tolerance).
    out_f32 = jax.block_until_ready(convrelu_forward(x, w, b, feed_dtype=jnp.float32))
    assert out_f32.shape == (N, Cout, H, W)
    assert jnp.allclose(out_f32, ref, atol=1e-4, rtol=1e-4), "f32 mismatch vs reference"

    # Default (performance) path: bf16 MXU feeds, f32 accumulation.
    out = jax.block_until_ready(convrelu_forward(x, w, b))
    assert out.shape == (N, Cout, H, W)
    assert jnp.allclose(out, ref, atol=3e-2, rtol=3e-2), "bf16 mismatch vs reference"

    print("KERNEL_OK")
</pallas_src>

<mosaic_0001>
module attributes {stable_mosaic.version = 11 : i64} {
  func.func @convrelu_kernel(%arg0: i32, %arg1: memref<1x16x16x4xf32, #tpu.memory_space<vmem>>, %arg2: memref<8x36xf32, #tpu.memory_space<vmem>>, %arg3: memref<8x1xf32, #tpu.memory_space<vmem>>, %arg4: memref<1x8x256xf32, #tpu.memory_space<vmem>>) attributes {dimension_semantics = [#tpu.dimension_semantics<parallel>], iteration_bounds = array<i64: 2>, scalar_prefetch = 0 : i64, scratch_operands = 0 : i64, tpu.core_type = #tpu.core_type<tc>, window_params = [{transform_indices = @transform_0, window_bounds = array<i64: 1, 16, 16, 4>}, {pipeline_mode = #tpu.pipeline_mode<synchronous>, transform_indices = @transform_1, window_bounds = array<i64: 8, 36>}, {pipeline_mode = #tpu.pipeline_mode<synchronous>, transform_indices = @transform_2, window_bounds = array<i64: 8, 1>}, {transform_indices = @transform_3, window_bounds = array<i64: 1, 8, 256>}]} {
    %c0 = arith.constant 0 : index
    %c0_0 = arith.constant 0 : index
    %c0_1 = arith.constant 0 : index
    %c0_2 = arith.constant 0 : index
    %0 = vector.load %arg1[%c0, %c0_0, %c0_1, %c0_2] : memref<1x16x16x4xf32, #tpu.memory_space<vmem>>, vector<1x16x16x4xf32>
    %1 = vector.shape_cast %0 : vector<1x16x16x4xf32> to vector<16x16x4xf32>
    %cst = arith.constant 0.000000e+00 : f32
    %2 = vector.broadcast %cst : f32 to vector<1x16x4xf32>
    %cst_3 = arith.constant 0.000000e+00 : f32
    %3 = vector.broadcast %cst_3 : f32 to vector<18x1x4xf32>
    %4 = tpu.concatenate %2, %1, %2 in 0 : vector<1x16x4xf32>, vector<16x16x4xf32>, vector<1x16x4xf32> -> vector<18x16x4xf32>
    %5 = tpu.concatenate %3, %4, %3 in 1 : vector<18x1x4xf32>, vector<18x16x4xf32>, vector<18x1x4xf32> -> vector<18x18x4xf32>
    %6 = vector.extract_strided_slice %5 {offsets = [0, 0, 0], sizes = [16, 16, 4], strides = [1, 1, 1]} : vector<18x18x4xf32> to vector<16x16x4xf32>
    %7 = vector.extract_strided_slice %5 {offsets = [0, 1, 0], sizes = [16, 16, 4], strides = [1, 1, 1]} : vector<18x18x4xf32> to vector<16x16x4xf32>
    %8 = vector.extract_strided_slice %5 {offsets = [0, 2, 0], sizes = [16, 16, 4], strides = [1, 1, 1]} : vector<18x18x4xf32> to vector<16x16x4xf32>
    %9 = vector.extract_strided_slice %5 {offsets = [1, 0, 0], sizes = [16, 16, 4], strides = [1, 1, 1]} : vector<18x18x4xf32> to vector<16x16x4xf32>
    %10 = vector.extract_strided_slice %5 {offsets = [1, 1, 0], sizes = [16, 16, 4], strides = [1, 1, 1]} : vector<18x18x4xf32> to vector<16x16x4xf32>
    %11 = vector.extract_strided_slice %5 {offsets = [1, 2, 0], sizes = [16, 16, 4], strides = [1, 1, 1]} : vector<18x18x4xf32> to vector<16x16x4xf32>
    %12 = vector.extract_strided_slice %5 {offsets = [2, 0, 0], sizes = [16, 16, 4], strides = [1, 1, 1]} : vector<18x18x4xf32> to vector<16x16x4xf32>
    %13 = vector.extract_strided_slice %5 {offsets = [2, 1, 0], sizes = [16, 16, 4], strides = [1, 1, 1]} : vector<18x18x4xf32> to vector<16x16x4xf32>
    %14 = vector.extract_strided_slice %5 {offsets = [2, 2, 0], sizes = [16, 16, 4], strides = [1, 1, 1]} : vector<18x18x4xf32> to vector<16x16x4xf32>
    %15 = tpu.concatenate %6, %7, %8, %9, %10, %11, %12, %13, %14 in 2 : vector<16x16x4xf32>, vector<16x16x4xf32>, vector<16x16x4xf32>, vector<16x16x4xf32>, vector<16x16x4xf32>, vector<16x16x4xf32>, vector<16x16x4xf32>, vector<16x16x4xf32>, vector<16x16x4xf32> -> vector<16x16x36xf32>
    %16 = vector.shape_cast %15 : vector<16x16x36xf32> to vector<256x36xf32>
    %c0_4 = arith.constant 0 : index
    %c0_5 = arith.constant 0 : index
    %17 = vector.load %arg2[%c0_4, %c0_5] : memref<8x36xf32, #tpu.memory_space<vmem>>, vector<8x36xf32>
    %cst_6 = arith.constant dense<0.000000e+00> : vector<8x256xf32>
    %18 = tpu.matmul %17, %16, %cst_6 {dimension_numbers = #tpu.dot_dimension_numbers<[1], [1], [0], [0], [0, 0, 1, 0], [], []>} : vector<8x36xf32>, vector<256x36xf32>, vector<8x256xf32> -> vector<8x256xf32>
    %c0_7 = arith.constant 0 : index
    %c0_8 = arith.constant 0 : index
    %19 = vector.load %arg3[%c0_7, %c0_8] : memref<8x1xf32, #tpu.memory_space<vmem>>, vector<8x1xf32>
    %20 = vector.broadcast %19 : vector<8x1xf32> to vector<8x256xf32>
    %21 = arith.addf %18, %20 : vector<8x256xf32>
    %cst_9 = arith.constant 0.000000e+00 : f32
    %22 = vector.broadcast %cst_9 : f32 to vector<8x256xf32>
    %23 = arith.maximumf %21, %22 : vector<8x256xf32>
    %c0_10 = arith.constant 0 : index
    %c0_11 = arith.constant 0 : index
    %c0_12 = arith.constant 0 : index
    %24 = vector.load %arg4[%c0_10, %c0_11, %c0_12] : memref<1x8x256xf32, #tpu.memory_space<vmem>>, vector<1x8x256xf32>
    %25 = vector.shape_cast %24 : vector<1x8x256xf32> to vector<8x256xf32>
    %26 = vector.shape_cast %23 : vector<8x256xf32> to vector<1x8x256xf32>
    tpu.vector_store %arg4[%c0_10, %c0_11, %c0_12], %26 {strides = array<i32>} : memref<1x8x256xf32, #tpu.memory_space<vmem>>, vector<1x8x256xf32>,
    return
  }
  func.func @transform_0(%arg0: i32) -> (i32, i32, i32, i32) {
    %c0_i32 = arith.constant 0 : i32
    %c0_i32_0 = arith.constant 0 : i32
    %c0_i32_1 = arith.constant 0 : i32
    %c0_i32_2 = arith.constant 0 : i32
    return %arg0, %c0_i32, %c0_i32_0, %c0_i32_1 : i32, i32, i32, i32
  }
  func.func @transform_1(%arg0: i32) -> (i32, i32) {
    %c0_i32 = arith.constant 0 : i32
    %c0_i32_0 = arith.constant 0 : i32
    %c0_i32_1 = arith.constant 0 : i32
    return %c0_i32, %c0_i32_0 : i32, i32
  }
  func.func @transform_2(%arg0: i32) -> (i32, i32) {
    %c0_i32 = arith.constant 0 : i32
    %c0_i32_0 = arith.constant 0 : i32
    %c0_i32_1 = arith.constant 0 : i32
    return %c0_i32, %c0_i32_0 : i32, i32
  }
  func.func @transform_3(%arg0: i32) -> (i32, i32, i32) {
    %c0_i32 = arith.constant 0 : i32
    %c0_i32_0 = arith.constant 0 : i32
    %c0_i32_1 = arith.constant 0 : i32
    return %arg0, %c0_i32, %c0_i32_0 : i32, i32, i32
  }
}

</mosaic_0001>

<bundles_post_ra>
// kernel: convrelu_forward.1
= control target key start
LH: loop header
LB: loop body
LE: loop exit
PB: predicated region body
PF: predicated region fallthrough
CT: control target
= control target key end

     0   :  { %s2670_s12 = smov 0   ;;  %s3946_s0 = inlined_call_operand.vmem [shape: f32[2,16,16,4], index: 0, kind: input, shape index: {}]   ;;  %s3947_s1 = inlined_call_operand.vmem [shape: f32[8,36], index: 1, kind: input, shape index: {}]   ;;  %s3948_s2 = inlined_call_operand.vmem [shape: f32[8,1], index: 2, kind: input, shape index: {}]   ;;  %s3949_s3 = inlined_call_operand.vmem [shape: f32[2,8,256], index: 3, kind: output, shape index: {}]  }
   0x1 LB: > { %s1845_s13 = sadd.s32 4294967295, %s2638_s12   ;;  %p1849_p0 = scmp.ge.s32.totalorder %s2638_s12, 1  ;;  %s2638_s12 = sphi %s2670_s12, %s13_s12  }
   0x2   : > { %p137_p1 = scmp.lt.s32.totalorder %s2638_s12, 3 }
   0x4   : > { %p138_p2 = pnand %p1849_p0, %p137_p1 }
   0x6   : > { %141 = sbr.rel (%p138_p2) target bundleno = 635 (0x27b), region = 32 }
   0xd   : > { %vm236_vm0 = vcmask 1040384   ;;  %p161_p3 = scmp.lt.s32.totalorder %s1845_s13, 1  ;;  %v2640_v0 = vmov 0.0   ;;  %vm402_vm1 = vcmask 1046528   ;;  %vm579_vm2 = vcmask 1045504   ;;  %s2641_s18 = smov 4  }
   0xe   : > { %v2678_v1 = vrot.slane %v2640_v0, 7  ;;  %s2642_s19 = smov 8   ;;  %s2643_s20 = smov 12   ;;  %vm1344_vm3 = vcmask 31744   ;;  %vm1377_vm4 = vcmask 64512   ;;  %vm1410_vm5 = vcmask 97280  }
   0xf   : > { %s4081_s13 = smov (!%p161_p3, %s1845_s13), 1  ;;  %s2644_s21 = smov 16   ;;  %vm1443_vm6 = vcmask 130048   ;;  %vm1476_vm7 = vcmask 162816   ;;  %vm1509_vm8 = vcmask 195584   ;;  %vm1542_vm9 = vcmask 228352  }
  0x10   : > { %3997 = vst [vmem:[#allocation2_spill] sm:$0xff] %v2678_v1  ;;  %v2684_v2 = vsel %vm236_vm0, 0.0, %v2678_v1  ;;  %v353_v3 = vsel %vm236_vm0, %v2678_v1, 0.0  ;;  %v404_v4 = vrot.slane %v2678_v1, 1  ;;  %v581_v5 = vrot.slane %v2678_v1, 2  ;;  %s1889_s14 = sshll.u32 %s4081_s13, 8 }
  0x11   : > { %3998 = vst [vmem:[#allocation3_spill] sm:$0xff] %v2684_v2  ;;  %v403_v6 = vrot.slane %v2684_v2, 1  ;;  %v406_v7 = vrot.slane %v353_v3, 1  ;;  %v583_v8 = vrot.slane %v353_v3, 2  ;;  %v580_v9 = vrot.slane %v2684_v2, 2  ;;  %s2696_s17 = scalar_lea.vmem %s3946_s0, %s1889_s14  ;;  %s2645_s22 = smov 20  }
  0x12   : > { %v173_v12 = vld [vmem:[%s2696_s17 + $0x10] sm:$0xff]  ;;  %v174_v13 = vld [vmem:[%s2696_s17 + $0x18] sm:$0xff]  ;;  %v171_v14 = vld [vmem:[%s2696_s17] sm:$0xff]  ;;  %s2646_s23 = smov 24   ;;  %s2647_s24 = smov 28   ;;  %vm1575_vm10 = vcmask 261120  }
  0x13   : > { %v405_v10 = vsel %vm402_vm1, %v403_v6, %v404_v4  ;;  %v407_v11 = vsel %vm402_vm1, %v404_v4, %v406_v7  ;;  %v2704_v15 = vsel %vm579_vm2, %v580_v9, %v581_v5  ;;  %v2707_v16 = vsel %vm579_vm2, %v581_v5, %v583_v8  ;;  %v172_v20 = vld [vmem:[%s2696_s17 + $0x8] sm:$0xff]  ;;  %v175_v21 = vld [vmem:[%s2696_s17 + $0x20] sm:$0xff]  ;;  %v177_v27 = vld [vmem:[%s2696_s17 + $0x30] sm:$0xff]  ;;  %s2648_s25 = smov 32   ;;  %s1890_s30 = sshll.u32 %s4081_s13, 4 }
  0x14   : > { %v2709_v17 = vpack.i.bf16 %v407_v11, %v405_v10  ;;  %v242_v18 = vrot.slane %v173_v12, 7  ;;  %v243_v19 = vrot.slane %v174_v13, 7  ;;  %v176_v22 = vld [vmem:[%s2696_s17 + $0x28] sm:$0xff]  ;;  %v239_v23 = vrot.slane %v171_v14, 7  ;;  %v178_v44 = vld [vmem:[%s2696_s17 + $0x38] sm:$0xff]  ;;  %v179_v45 = vld [vmem:[%s2696_s17 + $0x40] sm:$0xff]  ;;  %s170_s6 = scalar_lea.vmem %s3949_s3, %s1890_s30 }
  0x15   : > { %v240_v24 = vrot.slane %v172_v20, 7  ;;  %v245_v25 = vrot.slane %v175_v21, 7  ;;  %v246_v26 = vrot.slane %v176_v22, 7  ;;  %v248_v31 = vrot.slane %v177_v27, 7  ;;  %v180_v54 = vld [vmem:[%s2696_s17 + $0x48] sm:$0xff]  ;;  %v181_v59 = vld [vmem:[%s2696_s17 + $0x50] sm:$0xff] }
  0x16   : > { %3999 = vst [vmem:[#allocation4_spill] sm:$0xff] %v2709_v17  ;;  %1992 = vrot.lane.b32.xlu0 %v2709_v17, %s2641_s18  ;;  %v2718_v28 = vsel %vm236_vm0, %v242_v18, %v243_v19  ;;  %v2721_v29 = vsel %vm236_vm0, 0.0, %v242_v18  ;;  %v2724_v30 = vsel %vm236_vm0, %v243_v19, 0.0  ;;  %v2734_v37 = vsel %vm236_vm0, 0.0, %v239_v23  ;;  %v182_v0 = vld [vmem:[%s2696_s17 + $0x58] sm:$0xff]  ;;  %v183_v22 = vld [vmem:[%s2696_s17 + $0x60] sm:$0xff] }
  0x17   : > { %4000 = vst [vmem:[#allocation5_spill] sm:$0xff] %v2718_v28  ;;  %4001 = vst [vmem:[#allocation6_spill] sm:$0xff] %v2721_v29  ;;  %v413_v32 = vrot.slane %v2721_v29, 1  ;;  %v414_v33 = vrot.slane %v2718_v28, 1  ;;  %v416_v34 = vrot.slane %v2724_v30, 1  ;;  %v2731_v36 = vsel %vm236_vm0, %v239_v23, %v240_v24  ;;  %v184_v23 = vld [vmem:[%s2696_s17 + $0x68] sm:$0xff] }
  0x18   : > { %v2737_v38 = vsel %vm236_vm0, %v240_v24, 0.0  ;;  %v2740_v39 = vsel %vm236_vm0, %v245_v25, %v246_v26  ;;  %v408_v42 = vrot.slane %v2734_v37, 1  ;;  %v409_v43 = vrot.slane %v2731_v36, 1 }
  0x19   : > { %v415_v40 = vsel %vm402_vm1, %v413_v32, %v414_v33  ;;  %v417_v41 = vsel %vm402_vm1, %v414_v33, %v416_v34  ;;  %v411_v47 = vrot.slane %v2737_v38, 1  ;;  %v2752_v48 = vsel %vm236_vm0, 0.0, %v245_v25  ;;  %v186_v32 = vld [vmem:[%s2696_s17 + $0x78] sm:$0xff]  ;;  %v187_v33 = vld [vmem:[%s2696_s17 + $0x80] sm:$0xff] }
  0x1a   : > { %v2748_v46 = vpack.i.bf16 %v417_v41, %v415_v40  ;;  %v2755_v49 = vsel %vm236_vm0, %v246_v26, 0.0  ;;  %v410_v50 = vsel %vm402_vm1, %v408_v42, %v409_v43  ;;  %v418_v51 = vrot.slane %v2752_v48, 1 }
  0x1b   : > { %v419_v52 = vrot.slane %v2740_v39, 1  ;;  %v421_v53 = vrot.slane %v2755_v49, 1  ;;  %v412_v55 = vsel %vm402_vm1, %v409_v43, %v411_v47  ;;  %v249_v56 = vrot.slane %v178_v44, 7 }
  0x1c   : > { %4002 = vst [vmem:[#allocation7_spill] sm:$0xff] %v2748_v46  ;;  %2002 = vrot.lane.b32.xlu1 %v2748_v46, %s2641_s18  ;;  %v2766_v57 = vsel %vm236_vm0, 0.0, %v248_v31  ;;  %v251_v58 = vrot.slane %v179_v45, 7  ;;  %v2769_v60 = vpack.i.bf16 %v412_v55, %v410_v50  ;;  %v252_v6 = vrot.slane %v180_v54, 7 }
  0x1d   : > { %v420_v61 = vsel %vm402_vm1, %v418_v51, %v419_v52  ;;  %v422_v62 = vsel %vm402_vm1, %v419_v52, %v421_v53  ;;  %v423_v63 = vrot.slane %v2766_v57, 1  ;;  %v2778_v4 = vsel %vm236_vm0, %v248_v31, %v249_v56  ;;  %v185_v31 = vld [vmem:[%s2696_s17 + $0x70] sm:$0xff]  ;;  %v188_v53 = vld [vmem:[%s2696_s17 + $0x88] sm:$0xff] }
  0x1e   : > { %4003 = vst [vmem:[#allocation8_spill] sm:$0xff] %v2769_v60  ;;  %v2775_v3 = vpack.i.bf16 %v422_v62, %v420_v61  ;;  %v2781_v5 = vsel %vm236_vm0, %v249_v56, 0.0  ;;  %1997 = vrot.lane.b32.xlu0 %v2769_v60, %s2641_s18  ;;  %v424_v7 = vrot.slane %v2778_v4, 1  ;;  %v2788_v9 = vsel %vm236_vm0, 0.0, %v251_v58 }
  0x1f   : > { %v426_v8 = vrot.slane %v2781_v5, 1  ;;  %v254_v10 = vrot.slane %v181_v59, 7  ;;  %v2793_v11 = vsel %vm236_vm0, %v251_v58, %v252_v6  ;;  %v2796_v12 = vsel %vm236_vm0, %v252_v6, 0.0 }
  0x20   : > { %4004 = vst [vmem:[#allocation9_spill] sm:$0xff] %v2775_v3  ;;  %2007 = vrot.lane.b32.xlu1 %v2775_v3, %s2641_s18  ;;  %v428_v13 = vrot.slane %v2788_v9, 1  ;;  %v255_v14 = vrot.slane %v182_v0, 7  ;;  %v425_v18 = vsel %vm402_vm1, %v423_v63, %v424_v7  ;;  %v429_v20 = vrot.slane %v2793_v11, 1 }
  0x21   : > { %v427_v19 = vsel %vm402_vm1, %v424_v7, %v426_v8  ;;  %v431_v21 = vrot.slane %v2796_v12, 1  ;;  %v2811_v26 = vsel %vm236_vm0, 0.0, %v254_v10  ;;  %v257_v45 = vrot.slane %v183_v22, 7 }
  0x22   : > { %v2805_v24 = vpack.i.bf16 %v427_v19, %v425_v18  ;;  %v2808_v25 = vsel %vm236_vm0, %v254_v10, %v255_v14  ;;  %v2814_v27 = vsel %vm236_vm0, %v255_v14, 0.0  ;;  %v430_v34 = vsel %vm402_vm1, %v428_v13, %v429_v20 }
  0x23   : > { %v432_v40 = vsel %vm402_vm1, %v429_v20, %v431_v21  ;;  %v433_v41 = vrot.slane %v2811_v26, 1  ;;  %v434_v42 = vrot.slane %v2808_v25, 1  ;;  %v436_v44 = vrot.slane %v2814_v27, 1  ;;  %v189_v20 = vld [vmem:[%s2696_s17 + $0x90] sm:$0xff]  ;;  %v190_v21 = vld [vmem:[%s2696_s17 + $0x98] sm:$0xff] }
  0x24   : > { %4005 = vst [vmem:[#allocation10_spill] sm:$0xff] %v2805_v24  ;;  %2012 = vrot.lane.b32.xlu0 %v2805_v24, %s2641_s18  ;;  %v2825_v43 = vpack.i.bf16 %v432_v40, %v430_v34  ;;  %v258_v47 = vrot.slane %v184_v23, 7  ;;  %v260_v51 = vrot.slane %v185_v31, 7  ;;  %v261_v52 = vrot.slane %v186_v32, 7  ;;  %v192_v34 = vld [vmem:[%s2696_s17 + $0xa8] sm:$0xff] }
  0x25   : > { %v435_v50 = vsel %vm402_vm1, %v433_v41, %v434_v42  ;;  %v263_v54 = vrot.slane %v187_v33, 7  ;;  %v437_v55 = vsel %vm402_vm1, %v434_v42, %v436_v44  ;;  %v2837_v58 = vsel %vm236_vm0, 0.0, %v257_v45  ;;  %v191_v33 = vld [vmem:[%s2696_s17 + $0xa0] sm:$0xff] }
  0x26   : > { %4006 = vst [vmem:[#allocation11_spill] sm:$0xff] %v2825_v43  ;;  %2017 = vrot.lane.b32.xlu1 %v2825_v43, %s2641_s18  ;;  %v2834_v56 = vsel %vm236_vm0, %v257_v45, %v258_v47  ;;  %v2840_v59 = vsel %vm236_vm0, %v258_v47, 0.0  ;;  %v2842_v61 = vpack.i.bf16 %v437_v55, %v435_v50  ;;  %v438_v62 = vrot.slane %v2837_v58, 1 }
  0x27   : > { %v439_v63 = vrot.slane %v2834_v56, 1  ;;  %v441_v0 = vrot.slane %v2840_v59, 1  ;;  %v2848_v6 = vsel %vm236_vm0, %v260_v51, %v261_v52  ;;  %v2851_v7 = vsel %vm236_vm0, 0.0, %v260_v51 }
  0x28   : > { %4007 = vst [vmem:[#allocation12_spill] sm:$0xff] %v2842_v61  ;;  %v2854_v8 = vsel %vm236_vm0, %v261_v52, 0.0  ;;  %v264_v10 = vrot.slane %v188_v53, 7  ;;  %2022 = vrot.lane.b32.xlu0 %v2842_v61, %s2641_s18  ;;  %v443_v18 = vrot.slane %v2851_v7, 1  ;;  %v444_v19 = vrot.slane %v2848_v6, 1 }
  0x29   : > { %v440_v13 = vsel %vm402_vm1, %v438_v62, %v439_v63  ;;  %v442_v14 = vsel %vm402_vm1, %v439_v63, %v441_v0  ;;  %v446_v23 = vrot.slane %v2854_v8, 1  ;;  %v2871_v32 = vsel %vm236_vm0, 0.0, %v263_v54  ;;  %v193_v62 = vld [vmem:[%s2696_s17 + $0xb0] sm:$0xff] }
  0x2a   : > { %v2864_v22 = vpack.i.bf16 %v442_v14, %v440_v13  ;;  %v2868_v31 = vsel %vm236_vm0, %v263_v54, %v264_v10  ;;  %4009 = vst [vmem:[#allocation14_spill] sm:$0xff] %v2871_v32  ;;  %v445_v40 = vsel %vm402_vm1, %v443_v18, %v444_v19  ;;  %v2877_v41 = vsel %vm236_vm0, %v264_v10, 0.0 }
  0x2b   : > { %v448_v42 = vrot.slane %v2871_v32, 1  ;;  %v449_v44 = vrot.slane %v2868_v31, 1  ;;  %v447_v45 = vsel %vm402_vm1, %v444_v19, %v446_v23  ;;  %v451_v47 = vrot.slane %v2877_v41, 1 }
  0x2c   : > { %4008 = vst [vmem:[#allocation13_spill] sm:$0xff] %v2864_v22  ;;  %2027 = vrot.lane.b32.xlu1 %v2864_v22, %s2641_s18  ;;  %v266_v50 = vrot.slane %v189_v20, 7  ;;  %v267_v51 = vrot.slane %v190_v21, 7  ;;  %v2885_v52 = vpack.i.bf16 %v447_v45, %v445_v40  ;;  %v269_v54 = vrot.slane %v191_v33, 7  ;;  %v194_v21 = vld [vmem:[%s2696_s17 + $0xb8] sm:$0xff]  ;;  %v199_v22 = vld [vmem:[%s2696_s17 + $0xe0] sm:$0xff] }
  0x2d   : > { %v450_v53 = vsel %vm402_vm1, %v448_v42, %v449_v44  ;;  %v270_v55 = vrot.slane %v192_v34, 7  ;;  %v452_v63 = vsel %vm402_vm1, %v449_v44, %v451_v47  ;;  %v272_v40 = vrot.slane %v193_v62, 7  ;;  %v195_v42 = vld [vmem:[%s2696_s17 + $0xc0] sm:$0xff]  ;;  %v196_v44 = vld [vmem:[%s2696_s17 + $0xc8] sm:$0xff] }
  0x2e   : > { %4010 = vst [vmem:[#allocation15_spill] sm:$0xff] %v2885_v52  ;;  %v2891_v0 = vsel %vm236_vm0, %v266_v50, %v267_v51  ;;  %v2894_v10 = vsel %vm236_vm0, 0.0, %v266_v50  ;;  %v2897_v13 = vsel %vm236_vm0, %v267_v51, 0.0  ;;  %2032 = vrot.lane.b32.xlu0 %v2885_v52, %s2641_s18  ;;  %v2901_v14 = vpack.i.bf16 %v452_v63, %v450_v53  ;;  %v197_v53 = vld [vmem:[%s2696_s17 + $0xd0] sm:$0xff] }
  0x2f   : > { %4011 = vst [vmem:[#allocation16_spill] sm:$0xff] %v2891_v0  ;;  %4012 = vst [vmem:[#allocation17_spill] sm:$0xff] %v2894_v10  ;;  %v453_v18 = vrot.slane %v2894_v10, 1  ;;  %v454_v19 = vrot.slane %v2891_v0, 1  ;;  %v456_v20 = vrot.slane %v2897_v13, 1  ;;  %v2908_v23 = vsel %vm236_vm0, %v269_v54, %v270_v55 }
  0x30   : > { %4013 = vst [vmem:[#allocation18_spill] sm:$0xff] %v2901_v14  ;;  %4014 = vst [vmem:[#allocation19_spill] sm:$0xff] %v2908_v23  ;;  %v2911_v33 = vsel %vm236_vm0, 0.0, %v269_v54  ;;  %v2914_v34 = vsel %vm236_vm0, %v270_v55, 0.0  ;;  %2037 = vrot.lane.b32.xlu1 %v2901_v14, %s2641_s18  ;;  %v459_v51 = vrot.slane %v2908_v23, 1  ;;  %v273_v62 = vrot.slane %v194_v21, 7 }
  0x31   : > { %4015 = vst [vmem:[#allocation20_spill] sm:$0xff] %v2911_v33  ;;  %v455_v45 = vsel %vm402_vm1, %v453_v18, %v454_v19  ;;  %v457_v47 = vsel %vm402_vm1, %v454_v19, %v456_v20  ;;  %v458_v50 = vrot.slane %v2911_v33, 1  ;;  %v461_v55 = vrot.slane %v2914_v34, 1  ;;  %v198_v19 = vld [vmem:[%s2696_s17 + $0xd8] sm:$0xff] }
  0x32   : > { %v2925_v54 = vpack.i.bf16 %v457_v47, %v455_v45  ;;  %v2929_v63 = vsel %vm236_vm0, 0.0, %v272_v40  ;;  %v275_v18 = vrot.slane %v195_v42, 7  ;;  %v276_v52 = vrot.slane %v196_v44, 7 }
  0x33   : > { %v460_v35 = vsel %vm402_vm1, %v458_v50, %v459_v51  ;;  %v463_v17 = vrot.slane %v2929_v63, 1  ;;  %v462_v20 = vsel %vm402_vm1, %v459_v51, %v461_v55  ;;  %v2938_v45 = vsel %vm236_vm0, %v272_v40, %v273_v62 }
  0x34   : > { %4016 = vst [vmem:[#allocation21_spill] sm:$0xff] %v2925_v54  ;;  %2042 = vrot.lane.b32.xlu0 %v2925_v54, %s2641_s18  ;;  %v2941_v21 = vsel %vm236_vm0, %v273_v62, 0.0  ;;  %v278_v47 = vrot.slane %v197_v53, 7  ;;  %v2943_v50 = vpack.i.bf16 %v462_v20, %v460_v35  ;;  %v464_v42 = vrot.slane %v2938_v45, 1 }
  0x35   : > { %v466_v44 = vrot.slane %v2941_v21, 1  ;;  %v2948_v2 = vsel %vm236_vm0, %v275_v18, %v276_v52  ;;  %v2951_v51 = vsel %vm236_vm0, 0.0, %v275_v18  ;;  %v2954_v40 = vsel %vm236_vm0, %v276_v52, 0.0  ;;  %v200_v18 = vld [vmem:[%s2696_s17 + $0xe8] sm:$0xff] }
  0x36   : > { %4017 = vst [vmem:[#allocation22_spill] sm:$0xff] %v2943_v50  ;;  %v469_v55 = vrot.slane %v2948_v2, 1  ;;  %v279_v62 = vrot.slane %v198_v19, 7  ;;  %2047 = vrot.lane.b32.xlu1 %v2943_v50, %s2641_s18  ;;  %v465_v35 = vsel %vm402_vm1, %v463_v17, %v464_v42  ;;  %v468_v20 = vrot.slane %v2951_v51, 1 }
  0x37   : > { %v467_v53 = vsel %vm402_vm1, %v464_v42, %v466_v44  ;;  %v471_v1 = vrot.slane %v2954_v40, 1  ;;  %v2971_v19 = vsel %vm236_vm0, 0.0, %v278_v47  ;;  %v282_v3 = vrot.slane %v200_v18, 7 }
  0x38   : > { %v2965_v61 = vpack.i.bf16 %v467_v53, %v465_v35  ;;  %v2968_v52 = vsel %vm236_vm0, %v278_v47, %v279_v62  ;;  %v2974_v43 = vsel %vm236_vm0, %v279_v62, 0.0  ;;  %v470_v17 = vsel %vm402_vm1, %v468_v20, %v469_v55 }
  0x39   : > { %v472_v42 = vsel %vm402_vm1, %v469_v55, %v471_v1  ;;  %v473_v44 = vrot.slane %v2971_v19, 1  ;;  %v474_v24 = vrot.slane %v2968_v52, 1  ;;  %v476_v53 = vrot.slane %v2974_v43, 1 }
  0x3a   : > { %4018 = vst [vmem:[#allocation23_spill] sm:$0xff] %v2965_v61  ;;  %2052 = vrot.lane.b32.xlu0 %v2965_v61, %s2641_s18  ;;  %v2982_v35 = vpack.i.bf16 %v472_v42, %v470_v17  ;;  %v281_v47 = vrot.slane %v199_v22, 7  ;;  %v2988_v20 = vpack.i.bf16 %v2707_v16, %v2704_v15  ;;  %v585_v1 = vrot.slane %v2734_v37, 2 }
  0x3b   : > { %v475_v62 = vsel %vm402_vm1, %v473_v44, %v474_v24  ;;  %v477_v55 = vsel %vm402_vm1, %v474_v24, %v476_v53  ;;  %v3001_v22 = vsel %vm236_vm0, %v282_v3, 0.0  ;;  %v588_v24 = vrot.slane %v2737_v38, 2 }
  0x3c   : > { %4019 = vst [vmem:[#allocation24_spill] sm:$0xff] %v2982_v35  ;;  %4020 = vst [vmem:[#allocation25_spill] sm:$0xff] %v2988_v20  ;;  %2057 = vrot.lane.b32.xlu1 %v2982_v35, %s2641_s18  ;;  %v2995_v17 = vsel %vm236_vm0, %v281_v47, %v282_v3  ;;  %v2998_v42 = vsel %vm236_vm0, 0.0, %v281_v47  ;;  %v3003_v18 = vpack.i.bf16 %v477_v55, %v475_v62  ;;  %v481_v44 = vrot.slane %v3001_v22, 1 }
  0x3d   : > { %v478_v15 = vrot.slane %v2998_v42, 1  ;;  %v479_v16 = vrot.slane %v2995_v17, 1  ;;  %v586_v35 = vrot.slane %v2731_v36, 2  ;;  %v590_v53 = vrot.slane %v2721_v29, 2 }
  0x3e   : > { %4021 = vst [vmem:[#allocation26_spill] sm:$0xff] %v3003_v18  ;;  %v591_v47 = vrot.slane %v2718_v28, 2  ;;  %2062 = vrot.lane.b32.xlu0 %v3003_v18, %s2641_s18  ;;  %v595_v55 = vrot.slane %v2752_v48, 2  ;;  %v596_v61 = vrot.slane %v2740_v39, 2  ;;  %v4022_v18 = vrot.slane %v2724_v30, 2 }
  0x3f   : > { %v480_v3 = vsel %vm402_vm1, %v478_v15, %v479_v16  ;;  %v482_v62 = vsel %vm402_vm1, %v479_v16, %v481_v44  ;;  %v587_v46 = vsel %vm579_vm2, %v585_v1, %v586_v35  ;;  %v589_v38 = vsel %vm579_vm2, %v586_v35, %v588_v24 }
  0x40   : > { %v3018_v50 = vpack.i.bf16 %v482_v62, %v480_v3  ;;  %v592_v54 = vsel %vm579_vm2, %v590_v53, %v591_v47  ;;  %v3023_v60 = vpack.i.bf16 %v589_v38, %v587_v46  ;;  %v594_v15 = vsel %vm579_vm2, %v591_v47, %v4022_v18 }
  0x41   : > { %v597_v16 = vsel %vm579_vm2, %v595_v55, %v596_v61  ;;  %v598_v44 = vrot.slane %v2755_v49, 2  ;;  %v3032_v3 = vpack.i.bf16 %v594_v15, %v592_v54  ;;  %v600_v1 = vrot.slane %v2766_v57, 2 }
  0x42   : > { %2067 = vrot.lane.b32.xlu1 %v3018_v50, %s2641_s18  ;;  %v601_v35 = vrot.slane %v2778_v4, 2  ;;  %v603_v46 = vrot.slane %v2781_v5, 2  ;;  %2072 = vrot.lane.b32.xlu0 %v2988_v20, %s2642_s19  ;;  %v605_v18 = vrot.slane %v2788_v9, 2  ;;  %v606_v49 = vrot.slane %v2793_v11, 2 }
  0x43   : > { %v599_v30 = vsel %vm579_vm2, %v596_v61, %v598_v44  ;;  %v608_v24 = vrot.slane %v2796_v12, 2  ;;  %v610_v47 = vrot.slane %v2811_v26, 2  ;;  %v611_v55 = vrot.slane %v2808_v25, 2 }
  0x44   : > { %v602_v54 = vsel %vm579_vm2, %v600_v1, %v601_v35  ;;  %v604_v53 = vsel %vm579_vm2, %v601_v35, %v603_v46  ;;  %v607_v5 = vsel %vm579_vm2, %v605_v18, %v606_v49  ;;  %v3051_v61 = vpack.i.bf16 %v599_v30, %v597_v16 }
  0x45   : > { %v609_v62 = vsel %vm579_vm2, %v606_v49, %v608_v24  ;;  %v613_v38 = vrot.slane %v2814_v27, 2  ;;  %v615_v12 = vrot.slane %v2837_v58, 2  ;;  %v616_v15 = vrot.slane %v2834_v56, 2 }
  0x46   : > { %2077 = vrot.lane.b32.xlu1 %v3023_v60, %s2642_s19  ;;  %2082 = vrot.lane.b32.xlu0 %v3032_v3, %s2642_s19  ;;  %v3058_v44 = vpack.i.bf16 %v604_v53, %v602_v54  ;;  %v618_v1 = vrot.slane %v2840_v59, 2  ;;  %v620_v35 = vrot.slane %v2851_v7, 2  ;;  %v621_v46 = vrot.slane %v2848_v6, 2 }
  0x47   : > { %v3063_v18 = vpack.i.bf16 %v609_v62, %v607_v5  ;;  %v612_v16 = vsel %vm579_vm2, %v610_v47, %v611_v55  ;;  %v614_v27 = vsel %vm579_vm2, %v611_v55, %v613_v38  ;;  %v623_v30 = vrot.slane %v2854_v8, 2 }
  0x48   : > { %v617_v49 = vsel %vm579_vm2, %v615_v12, %v616_v15  ;;  %v619_v24 = vsel %vm579_vm2, %v616_v15, %v618_v1  ;;  %v625_v54 = vrot.slane %v2871_v32, 2  ;;  %v626_v59 = vrot.slane %v2868_v31, 2 }
  0x49   : > { %v622_v53 = vsel %vm579_vm2, %v620_v35, %v621_v46  ;;  %v624_v5 = vsel %vm579_vm2, %v621_v46, %v623_v30  ;;  %v628_v47 = vrot.slane %v2877_v41, 2  ;;  %v630_v62 = vrot.slane %v2894_v10, 2 }
  0x4a   : > { %2087 = vrot.lane.b32.xlu1 %v3051_v61, %s2642_s19  ;;  %2092 = vrot.lane.b32.xlu0 %v3058_v44, %s2642_s19  ;;  %v3080_v8 = vpack.i.bf16 %v614_v27, %v612_v16  ;;  %v631_v55 = vrot.slane %v2891_v0, 2  ;;  %v633_v38 = vrot.slane %v2897_v13, 2  ;;  %v3084_v12 = vpack.i.bf16 %v619_v24, %v617_v49 }
  0x4b   : > { %v3086_v15 = vpack.i.bf16 %v624_v5, %v622_v53  ;;  %v627_v1 = vsel %vm579_vm2, %v625_v54, %v626_v59  ;;  %v629_v35 = vsel %vm579_vm2, %v626_v59, %v628_v47  ;;  %v635_v46 = vrot.slane %v2911_v33, 2 }
  0x4c   : > { %v632_v41 = vsel %vm579_vm2, %v630_v62, %v631_v55  ;;  %v636_v16 = vrot.slane %v2908_v23, 2  ;;  %v638_v27 = vrot.slane %v2914_v34, 2  ;;  %v634_v13 = vsel %vm579_vm2, %v631_v55, %v633_v38 }
  0x4d   : > { %4023 = vst [vmem:[#allocation27_spill] sm:$0xff] %v3086_v15  ;;  %v640_v30 = vrot.slane %v2929_v63, 2  ;;  %v641_v49 = vrot.slane %v2938_v45, 2  ;;  %v643_v24 = vrot.slane %v2941_v21, 2  ;;  %v3102_v54 = vpack.i.bf16 %v629_v35, %v627_v1 }
  0x4e   : > { %2097 = vrot.lane.b32.xlu1 %v3063_v18, %s2642_s19  ;;  %2102 = vrot.lane.b32.xlu0 %v3080_v8, %s2642_s19  ;;  %v3106_v59 = vpack.i.bf16 %v634_v13, %v632_v41  ;;  %v637_v34 = vsel %vm579_vm2, %v635_v46, %v636_v16  ;;  %v645_v53 = vrot.slane %v2951_v51, 2  ;;  %v646_v5 = vrot.slane %v2948_v2, 2 }
  0x4f   : > { %4024 = vst [vmem:[#allocation28_spill] sm:$0xff] %v3102_v54  ;;  %v639_v47 = vsel %vm579_vm2, %v636_v16, %v638_v27  ;;  %v642_v21 = vsel %vm579_vm2, %v640_v30, %v641_v49  ;;  %v644_v62 = vsel %vm579_vm2, %v641_v49, %v643_v24  ;;  %v648_v55 = vrot.slane %v2954_v40, 2 }
  0x50   : > { %v650_v38 = vrot.slane %v2971_v19, 2  ;;  %v651_v1 = vrot.slane %v2968_v52, 2  ;;  %v653_v35 = vrot.slane %v2974_v43, 2  ;;  %v3122_v41 = vpack.i.bf16 %v639_v47, %v637_v34 }
  0x51   : > { %v3124_v46 = vpack.i.bf16 %v644_v62, %v642_v21  ;;  %v647_v16 = vsel %vm579_vm2, %v645_v53, %v646_v5  ;;  %v655_v27 = vrot.slane %v2998_v42, 2  ;;  %v649_v40 = vsel %vm579_vm2, %v646_v5, %v648_v55 }
  0x52   : > { %2107 = vrot.lane.b32.xlu1 %v3084_v12, %s2642_s19  ;;  %2112 = vrot.lane.b32.xlu0 %v3086_v15, %s2642_s19  ;;  %v656_v13 = vrot.slane %v2995_v17, 2  ;;  %v658_v43 = vrot.slane %v3001_v22, 2  ;;  %v652_v30 = vsel %vm579_vm2, %v650_v38, %v651_v1  ;;  %v654_v49 = vsel %vm579_vm2, %v651_v1, %v653_v35 }
  0x53   : > { %v3137_v24 = vpack.i.bf16 %v649_v40, %v647_v16  ;;  %v3141_v34 = vpack.i.bf16 %v654_v49, %v652_v30  ;;  %v2151_v47 = vpack.i.bf16 %v2731_v36, %v2734_v37  ;;  %v2156_v21 = vpack.i.bf16 %v2718_v28, %v2721_v29  ;;  %v4027_v30 = vld [vmem:[#allocation21_spill] sm:$0xff]  ;;  %v4028_v49 = vld [vmem:[#allocation7_spill] sm:$0xff] }
  0x54   : > { %v657_v53 = vsel %vm579_vm2, %v655_v27, %v656_v13  ;;  %v659_v5 = vsel %vm579_vm2, %v656_v13, %v658_v43  ;;  %v2161_v62 = vpack.i.bf16 %v2740_v39, %v2752_v48  ;;  %v2166_v55 = vpack.i.bf16 %v2778_v4, %v2766_v57  ;;  %v4026_v43 = vld [vmem:[#allocation8_spill] sm:$0xff] }
  0x55   : > { %v3147_v22 = vpack.i.bf16 %v659_v5, %v657_v53  ;;  %v3166_v38 = vpack.i.bf16 %v2793_v11, %v2788_v9  ;;  %v3171_v1 = vpack.i.bf16 %v2808_v25, %v2811_v26  ;;  %v3177_v35 = vpack.i.bf16 %v2834_v56, %v2837_v58 }
  0x56   : > { %2117 = vrot.lane.b32.xlu1 %v3102_v54, %s2642_s19  ;;  %2122 = vrot.lane.b32.xlu0 %v3106_v59, %s2642_s19  ;;  %v3183_v16 = vpack.i.bf16 %v2848_v6, %v2851_v7  ;;  %v3189_v27 = vpack.i.bf16 %v2868_v31, %v2871_v32  ;;  %v2196_v40 = vpack.i.bf16 %v2891_v0, %v2894_v10  ;;  %vm1615_vm11 = vcmask 293888  }
  0x57   : > { %v2201_v13 = vpack.i.bf16 %v2908_v23, %v2911_v33  ;;  %v2326_v33 = vpack.i.bf16 %v2938_v45, %v2929_v63  ;;  %vm3609_vm12 = vmpackc.low %vm1615_vm11, %vm1615_vm11 }
  0x58   : > { %4025 = vst [vmem:[#allocation29_spill] sm:$0xff] %v3189_v27 }
  0x5a   : > { %2127 = vrot.lane.b32.xlu1 %v3122_v41, %s2642_s19  ;;  %2132 = vrot.lane.b32.xlu0 %v3124_v46, %s2642_s19 }
  0x5e   : > { %2137 = vrot.lane.b32.xlu1 %v3137_v24, %s2642_s19  ;;  %2142 = vrot.lane.b32.xlu0 %v3141_v34, %s2642_s19 }
  0x62   : > { %2147 = vrot.lane.b32.xlu1 %v3147_v22, %s2642_s19  ;;  %2152 = vrot.lane.b32.xlu0 %v2151_v47, %s2643_s20 }
  0x66   : > { %2157 = vrot.lane.b32.xlu1 %v2156_v21, %s2643_s20  ;;  %2162 = vrot.lane.b32.xlu0 %v2161_v62, %s2643_s20 }
  0x6a   : > { %2167 = vrot.lane.b32.xlu1 %v2166_v55, %s2643_s20  ;;  %2172 = vrot.lane.b32.xlu0 %v3166_v38, %s2643_s20 }
  0x6e   : > { %2177 = vrot.lane.b32.xlu1 %v3171_v1, %s2643_s20  ;;  %2182 = vrot.lane.b32.xlu0 %v3177_v35, %s2643_s20 }
  0x72   : > { %2187 = vrot.lane.b32.xlu1 %v3183_v16, %s2643_s20  ;;  %2192 = vrot.lane.b32.xlu0 %v3189_v27, %s2643_s20 }
  0x76   : > { %2197 = vrot.lane.b32.xlu1 %v2196_v40, %s2643_s20  ;;  %2202 = vrot.lane.b32.xlu0 %v2201_v13, %s2643_s20 }
  0x7a   : > { %2207 = vrot.lane.b32.xlu1 %v2901_v14, %s2644_s21  ;;  %2212 = vrot.lane.b32.xlu0 %v4026_v43, %s2644_s21  ;;  %v4030_v43 = vld [vmem:[#allocation22_spill] sm:$0xff] }
  0x7e   : > { %2217 = vrot.lane.b32.xlu1 %v3102_v54, %s2645_s22  ;;  %2222 = vrot.lane.b32.xlu0 %v3023_v60, %s2645_s22  ;;  %v4035_v54 = vld [vmem:[#allocation10_spill] sm:$0xff] }
  0x82   : > { %2227 = vrot.lane.b32.xlu1 %v2196_v40, %s2646_s23  ;;  %2232 = vrot.lane.b32.xlu0 %v2156_v21, %s2646_s23 }
  0x86   : > { %2237 = vrot.lane.b32.xlu1 %v4027_v30, %s2647_s24  ;;  %2242 = vrot.lane.b32.xlu0 %v4028_v49, %s2647_s24 }
  0x88   : > { %v3219_v60 = vpop.permute.xlu0 %1992 }
  0x8a   : > { %2247 = vrot.lane.b32.xlu1 %v3106_v59, %s2648_s25  ;;  %2252 = vrot.lane.b32.xlu0 %v3032_v3, %s2648_s25 }
  0x8e   : > { %2257 = vrot.lane.b32.xlu1 %v4027_v30, %s2644_s21  ;;  %v3223_v53 = vpop.permute.xlu1 %2002  ;;  %2262 = vrot.lane.b32.xlu0 %v4028_v49, %s2644_s21  ;;  %v4031_v30 = vld [vmem:[#allocation9_spill] sm:$0xff] }
  0x8f   : > { %4029 = vst [vmem:[#allocation8_spill] sm:$0xff] %v3223_v53 }
  0x90   : > { %v3227_v5 = vpop.permute.xlu0 %1997 }
  0x92   : > { %2267 = vrot.lane.b32.xlu1 %v3106_v59, %s2645_s22  ;;  %v2008_v47 = vpop.permute.xlu1 %2007  ;;  %2272 = vrot.lane.b32.xlu0 %v3032_v3, %s2645_s22 }
  0x93   : > { %v2009_v14 = vunpack.i.l.bf16 %v2008_v47 }
  0x96   : > { %2277 = vrot.lane.b32.xlu1 %v2201_v13, %s2646_s23  ;;  %v2013_v21 = vpop.permute.xlu0 %2012  ;;  %2282 = vrot.lane.b32.xlu0 %v2161_v62, %s2646_s23 }
  0x97   : > { %v2015_v29 = vunpack.i.h.bf16 %v2013_v21  ;;  %v2014_v27 = vunpack.i.l.bf16 %v2013_v21 }
  0x98   : > { %v3235_v40 = vpop.permute.xlu1 %2017 }
  0x99   : > { %v2020_v21 = vunpack.i.h.bf16 %v3235_v40  ;;  %v1353_v15 = vsel %vm1344_vm3, %v2766_v57, %v2014_v27 }
  0x9a   : > { %2287 = vrot.lane.b32.xlu1 %v4030_v43, %s2647_s24  ;;  %2292 = vrot.lane.b32.xlu0 %v4031_v30, %s2647_s24  ;;  %v3241_v49 = vpop.permute.xlu0 %2022 }
  0x9e   : > { %2297 = vrot.lane.b32.xlu1 %v3122_v41, %s2648_s25  ;;  %v3245_v59 = vpop.permute.xlu1 %2027  ;;  %2302 = vrot.lane.b32.xlu0 %v3051_v61, %s2648_s25 }
  0xa0   : > { %v3249_v3 = vpop.permute.xlu0 %2032 }
  0xa2   : > { %2307 = vrot.lane.b32.xlu1 %v4030_v43, %s2644_s21  ;;  %2312 = vrot.lane.b32.xlu0 %v4031_v30, %s2644_s21  ;;  %v3255_v62 = vpop.permute.xlu1 %2037  ;;  %v4034_v30 = vld [vmem:[#allocation23_spill] sm:$0xff] }
  0xa6   : > { %2317 = vrot.lane.b32.xlu1 %v3122_v41, %s2645_s22  ;;  %v3259_v13 = vpop.permute.xlu0 %2042  ;;  %2322 = vrot.lane.b32.xlu0 %v3051_v61, %s2645_s22 }
  0xa7   : > { %4032 = vst [vmem:[#allocation21_spill] sm:$0xff] %v3259_v13 }
  0xa8   : > { %v3265_v23 = vpop.permute.xlu1 %2047 }
  0xa9   : > { %4033 = vst [vmem:[#allocation7_spill] sm:$0xff] %v3265_v23  ;;  %v2010_v23 = vunpack.i.h.bf16 %v2008_v47  ;;  %v1351_v47 = vsel %vm1344_vm3, %v2752_v48, %v2009_v14  ;;  %v2025_v48 = vunpack.i.h.bf16 %v3241_v49  ;;  %v2024_v14 = vunpack.i.l.bf16 %v3241_v49 }
  0xaa   : > { %2327 = vrot.lane.b32.xlu1 %v2326_v33, %s2646_s23  ;;  %2332 = vrot.lane.b32.xlu0 %v2166_v55, %s2646_s23 }
  0xac   : > { %v3269_v43 = vpop.permute.xlu0 %2052 }
  0xae   : > { %2337 = vrot.lane.b32.xlu1 %v4034_v30, %s2647_s24  ;;  %v3273_v41 = vpop.permute.xlu1 %2057  ;;  %2342 = vrot.lane.b32.xlu0 %v4035_v54, %s2647_s24 }
  0xb0   : > { %v3277_v20 = vpop.permute.xlu0 %2062 }
  0xb2   : > { %2347 = vrot.lane.b32.xlu1 %v3124_v46, %s2648_s25  ;;  %2352 = vrot.lane.b32.xlu0 %v3058_v44, %s2648_s25 }
  0xb4   : > { %v3283_v61 = vpop.permute.xlu1 %2067  ;;  %v3285_v55 = vpop.permute.xlu0 %2072 }
  0xb6   : > { %2357 = vrot.lane.b32.xlu1 %v2326_v33, %s2643_s20  ;;  %2362 = vrot.lane.b32.xlu0 %v4034_v30, %s2644_s21  ;;  %v2381_v33 = vpack.i.bf16 %v2948_v2, %v2951_v51  ;;  %v1352_v30 = vsel %vm1344_vm3, %v2740_v39, %v2010_v23 }
  0xb8   : > { %v3290_v10 = vpop.permute.xlu1 %2077  ;;  %v3292_v0 = vpop.permute.xlu0 %2082 }
  0xb9   : > { %4036 = vst [vmem:[#allocation22_spill] sm:$0xff] %v3292_v0  ;;  %v2019_v0 = vunpack.i.l.bf16 %v3235_v40 }
  0xba   : > { %2367 = vrot.lane.b32.xlu1 %v4035_v54, %s2644_s21  ;;  %2372 = vrot.lane.b32.xlu0 %v3124_v46, %s2645_s22  ;;  %v1354_v46 = vsel %vm1344_vm3, %v2778_v4, %v2015_v29 }
  0xbb   : > { %v1355_v27 = vsel %vm1344_vm3, %v2788_v9, %v2019_v0 }
  0xbc   : > { %v2088_v28 = vpop.permute.xlu1 %2087  ;;  %v2093_v53 = vpop.permute.xlu0 %2092 }
  0xbd   : > { %v2090_v54 = vunpack.i.h.bf16 %v2088_v28  ;;  %v2089_v13 = vunpack.i.l.bf16 %v2088_v28  ;;  %v2095_v32 = vunpack.i.h.bf16 %v2093_v53  ;;  %v2094_v39 = vunpack.i.l.bf16 %v2093_v53 }
  0xbe   : > { %2377 = vrot.lane.b32.xlu1 %v3058_v44, %s2645_s22  ;;  %2382 = vrot.lane.b32.xlu0 %v2381_v33, %s2646_s23  ;;  %v1356_v44 = vsel %vm1344_vm3, %v2793_v11, %v2020_v21  ;;  %v1357_v11 = vsel %vm1344_vm3, %v2811_v26, %v2024_v14  ;;  %v4037_v21 = vld [vmem:[#allocation24_spill] sm:$0xff]  ;;  %v4038_v14 = vld [vmem:[#allocation11_spill] sm:$0xff] }
  0xbf   : > { %v3315_v23 = vsel %vm1377_vm4, %v1352_v30, %v2090_v54  ;;  %v3318_v28 = vsel %vm1377_vm4, %v1351_v47, %v2089_v13  ;;  %v3322_v29 = vsel %vm1377_vm4, %v1353_v15, %v2094_v39  ;;  %v3325_v57 = vsel %vm1377_vm4, %v1354_v46, %v2095_v32 }
  0xc0   : > { %v2098_v4 = vpop.permute.xlu1 %2097  ;;  %v2103_v49 = vpop.permute.xlu0 %2102  ;;  %v2030_v13 = vunpack.i.h.bf16 %v3245_v59  ;;  %v2029_v30 = vunpack.i.l.bf16 %v3245_v59  ;;  %v1358_v32 = vsel %vm1344_vm3, %v2808_v25, %v2025_v48 }
  0xc1   : > { %v2100_v53 = vunpack.i.h.bf16 %v2098_v4  ;;  %v2099_v40 = vunpack.i.l.bf16 %v2098_v4  ;;  %v2105_v47 = vunpack.i.h.bf16 %v2103_v49  ;;  %v2104_v15 = vunpack.i.l.bf16 %v2103_v49 }
  0xc2   : > { %2387 = vrot.lane.b32.xlu1 %v3166_v38, %s2646_s23  ;;  %2392 = vrot.lane.b32.xlu0 %v4037_v21, %s2647_s24  ;;  %v1360_v26 = vsel %vm1344_vm3, %v2834_v56, %v2030_v13  ;;  %v1359_v48 = vsel %vm1344_vm3, %v2837_v58, %v2029_v30  ;;  %v2055_v56 = vunpack.i.h.bf16 %v3269_v43  ;;  %v2054_v58 = vunpack.i.l.bf16 %v3269_v43 }
  0xc3   : > { %v3340_v9 = vsel %vm1377_vm4, %v1356_v44, %v2100_v53  ;;  %v3343_v0 = vsel %vm1377_vm4, %v1355_v27, %v2099_v40  ;;  %v3348_v59 = vsel %vm1377_vm4, %v1357_v11, %v2104_v15  ;;  %v3351_v38 = vsel %vm1377_vm4, %v1358_v32, %v2105_v47 }
  0xc4   : > { %v2108_v54 = vpop.permute.xlu1 %2107  ;;  %v3353_v39 = vpop.permute.xlu0 %2112  ;;  %v2060_v49 = vunpack.i.h.bf16 %v3273_v41  ;;  %v2059_v13 = vunpack.i.l.bf16 %v3273_v41  ;;  %v1370_v32 = vsel %vm1344_vm3, %v2938_v45, %v2055_v56  ;;  %v1369_v43 = vsel %vm1344_vm3, %v2929_v63, %v2054_v58 }
  0xc5   : > { %v2110_v25 = vunpack.i.h.bf16 %v2108_v54  ;;  %v2109_v46 = vunpack.i.l.bf16 %v2108_v54  ;;  %v2064_v11 = vunpack.i.l.bf16 %v3277_v20  ;;  %v2436_v45 = vpack.i.bf16 %v2968_v52, %v2971_v19 }
  0xc6   : > { %2397 = vrot.lane.b32.xlu1 %v4038_v14, %s2647_s24  ;;  %2402 = vrot.lane.b32.xlu0 %v3137_v24, %s2648_s25  ;;  %v1372_v63 = vsel %vm1344_vm3, %v2948_v2, %v2060_v49 }
  0xc7   : > { %v3362_v4 = vsel %vm1377_vm4, %v1360_v26, %v2110_v25  ;;  %v3365_v44 = vsel %vm1377_vm4, %v1359_v48, %v2109_v46  ;;  %v1371_v25 = vsel %vm1344_vm3, %v2951_v51, %v2059_v13  ;;  %v2070_v48 = vunpack.i.h.bf16 %v3283_v61 }
  0xc8   : > { %v3369_v27 = vpop.permute.xlu1 %2117  ;;  %v3371_v53 = vpop.permute.xlu0 %2122  ;;  %v1373_v2 = vsel %vm1344_vm3, %v2971_v19, %v2064_v11 }
  0xc9   : > { %v1376_v19 = vsel %vm1344_vm3, %v2995_v17, %v2070_v48 }
  0xca   : > { %2407 = vrot.lane.b32.xlu1 %v3063_v18, %s2648_s25  ;;  %2412 = vrot.lane.b32.xlu0 %v2381_v33, %s2643_s20  ;;  %v2065_v33 = vunpack.i.h.bf16 %v3277_v20 }
  0xcc   : > { %v3378_v40 = vpop.permute.xlu1 %2127  ;;  %v2133_v30 = vpop.permute.xlu0 %2132 }
  0xcd   : > { %v2135_v47 = vunpack.i.h.bf16 %v2133_v30  ;;  %v2134_v15 = vunpack.i.l.bf16 %v2133_v30  ;;  %v1374_v30 = vsel %vm1344_vm3, %v2968_v52, %v2065_v33 }
  0xce   : > { %2417 = vrot.lane.b32.xlu1 %v4037_v21, %s2644_s21  ;;  %2422 = vrot.lane.b32.xlu0 %v4038_v14, %s2644_s21  ;;  %v2069_v14 = vunpack.i.l.bf16 %v3283_v61 }
  0xcf   : > { %v3393_v41 = vsel %vm1377_vm4, %v1369_v43, %v2134_v15  ;;  %v3396_v54 = vsel %vm1377_vm4, %v1370_v32, %v2135_v47 }
  0xd0   : > { %v2138_v21 = vpop.permute.xlu1 %2137  ;;  %v2143_v26 = vpop.permute.xlu0 %2142  ;;  %v1375_v32 = vsel %vm1344_vm3, %v2998_v42, %v2069_v14 }
  0xd1   : > { %v2140_v20 = vunpack.i.h.bf16 %v2138_v21  ;;  %v2139_v46 = vunpack.i.l.bf16 %v2138_v21  ;;  %v2145_v56 = vunpack.i.h.bf16 %v2143_v26  ;;  %v2144_v58 = vunpack.i.l.bf16 %v2143_v26  ;;  %v4043_v21 = vld [vmem:[#allocation26_spill] sm:$0xff] }
  0xd2   : > { %2427 = vrot.lane.b32.xlu1 %v3137_v24, %s2645_s22  ;;  %2432 = vrot.lane.b32.xlu0 %v3063_v18, %s2645_s22 }
  0xd3   : > { %v3413_v51 = vsel %vm1377_vm4, %v1372_v63, %v2140_v20  ;;  %v3416_v49 = vsel %vm1377_vm4, %v1371_v25, %v2139_v46  ;;  %v3421_v61 = vsel %vm1377_vm4, %v1373_v2, %v2144_v58  ;;  %v3424_v24 = vsel %vm1377_vm4, %v1374_v30, %v2145_v56  ;;  %v4044_v63 = vld [vmem:[#allocation12_spill] sm:$0xff] }
  0xd4   : > { %4039 = vst [vmem:[#allocation9_spill] sm:$0xff] %v3421_v61  ;;  %4040 = vst [vmem:[#allocation23_spill] sm:$0xff] %v3424_v24  ;;  %v2148_v13 = vpop.permute.xlu1 %2147  ;;  %v3426_v15 = vpop.permute.xlu0 %2152 }
  0xd5   : > { %v2150_v52 = vunpack.i.h.bf16 %v2148_v13  ;;  %v2149_v47 = vunpack.i.l.bf16 %v2148_v13 }
  0xd6   : > { %2437 = vrot.lane.b32.xlu1 %v2436_v45, %s2646_s23  ;;  %2442 = vrot.lane.b32.xlu0 %v3171_v1, %s2646_s23 }
  0xd7   : > { %v3434_v18 = vsel %vm1377_vm4, %v1376_v19, %v2150_v52  ;;  %v3437_v43 = vsel %vm1377_vm4, %v1375_v32, %v2149_v47  ;;  %v202_v32 = vld [vmem:[%s2696_s17 + $0xf8] sm:$0xff] }
  0xd8   : > { %4041 = vst [vmem:[#allocation10_spill] sm:$0xff] %v3434_v18  ;;  %4042 = vst [vmem:[#allocation24_spill] sm:$0xff] %v3437_v43  ;;  %v3441_v33 = vpop.permute.xlu1 %2157  ;;  %v3443_v11 = vpop.permute.xlu0 %2162  ;;  %v4050_v18 = vld [vmem:[#allocation2_spill] sm:$0xff]  ;;  %v4051_v43 = vld [vmem:[#allocation3_spill] sm:$0xff] }
  0xda   : > { %2447 = vrot.lane.b32.xlu1 %v4043_v21, %s2647_s24  ;;  %2452 = vrot.lane.b32.xlu0 %v4044_v63, %s2647_s24 }
  0xdc   : > { %v2168_v25 = vpop.permute.xlu1 %2167  ;;  %v2173_v26 = vpop.permute.xlu0 %2172 }
  0xdd   : > { %v2170_v20 = vunpack.i.h.bf16 %v2168_v25  ;;  %v2169_v46 = vunpack.i.l.bf16 %v2168_v25  ;;  %v2175_v48 = vunpack.i.h.bf16 %v2173_v26  ;;  %v2174_v14 = vunpack.i.l.bf16 %v2173_v26 }
  0xde   : > { %2457 = vrot.lane.b32.xlu1 %v3141_v34, %s2648_s25  ;;  %2462 = vrot.lane.b32.xlu0 %v3080_v8, %s2648_s25 }
  0xdf   : > { %v3453_v1 = vsel %vm1410_vm5, %v3318_v28, %v2169_v46  ;;  %v3457_v56 = vsel %vm1410_vm5, %v3315_v23, %v2170_v20  ;;  %v3463_v58 = vsel %vm1410_vm5, %v3322_v29, %v2174_v14  ;;  %v3467_v30 = vsel %vm1410_vm5, %v3325_v57, %v2175_v48  ;;  %v201_v57 = vld [vmem:[%s2696_s17 + $0xf0] sm:$0xff] }
  0xe0   : > { %v2178_v2 = vpop.permute.xlu1 %2177  ;;  %v2183_v52 = vpop.permute.xlu0 %2182 }
  0xe1   : > { %v2180_v13 = vunpack.i.h.bf16 %v2178_v2  ;;  %v2179_v28 = vunpack.i.l.bf16 %v2178_v2  ;;  %v2185_v47 = vunpack.i.h.bf16 %v2183_v52  ;;  %v2184_v19 = vunpack.i.l.bf16 %v2183_v52 }
  0xe2   : > { %2467 = vrot.lane.b32.xlu1 %v2436_v45, %s2643_s20  ;;  %2472 = vrot.lane.b32.xlu0 %v4043_v21, %s2644_s21  ;;  %v285_v21 = vrot.slane %v202_v32, 7 }
  0xe3   : > { %v3472_v23 = vsel %vm1410_vm5, %v3343_v0, %v2179_v28  ;;  %v3476_v29 = vsel %vm1410_vm5, %v3340_v9, %v2180_v13  ;;  %v3484_v25 = vsel %vm1410_vm5, %v3348_v59, %v2184_v19  ;;  %v3488_v45 = vsel %vm1410_vm5, %v3351_v38, %v2185_v47 }
  0xe4   : > { %4045 = vst [vmem:[#allocation11_spill] sm:$0xff] %v3484_v25  ;;  %4046 = vst [vmem:[#allocation26_spill] sm:$0xff] %v3488_v45  ;;  %v2188_v20 = vpop.permute.xlu1 %2187  ;;  %v3490_v26 = vpop.permute.xlu0 %2192  ;;  %v284_v9 = vrot.slane %v201_v57, 7  ;;  %v3506_v38 = vpack.i.bf16 %v2995_v17, %v2998_v42  ;;  %v1995_v19 = vunpack.i.h.bf16 %v3219_v60  ;;  %v1994_v57 = vunpack.i.l.bf16 %v3219_v60 }
  0xe5   : > { %v2190_v0 = vunpack.i.h.bf16 %v2188_v20  ;;  %v2189_v46 = vunpack.i.l.bf16 %v2188_v20  ;;  %v2035_v20 = vunpack.i.h.bf16 %v3249_v3  ;;  %v2194_v45 = vunpack.i.l.bf16 %v3490_v26 }
  0xe6   : > { %2477 = vrot.lane.b32.xlu1 %v4044_v63, %s2644_s21  ;;  %2482 = vrot.lane.b32.xlu0 %v3141_v34, %s2645_s22  ;;  %v352_v2 = vsel %vm236_vm0, 0.0, %v284_v9 }
  0xe7   : > { %v3496_v48 = vsel %vm1410_vm5, %v3365_v44, %v2189_v46  ;;  %v3500_v59 = vsel %vm1410_vm5, %v3362_v4, %v2190_v0  ;;  %v286_v44 = vsel %vm236_vm0, %v284_v9, %v285_v21  ;;  %v369_v4 = vsel %vm236_vm0, %v285_v21, 0.0 }
  0xe8   : > { %4047 = vst [vmem:[#allocation12_spill] sm:$0xff] %v3496_v48  ;;  %4048 = vst [vmem:[#allocation30_spill] sm:$0xff] %v3500_v59  ;;  %v3508_v14 = vpop.permute.xlu1 %2197  ;;  %v3510_v63 = vpop.permute.xlu0 %2202  ;;  %v854_v42 = vrot.slane %v352_v2, 1  ;;  %v855_v13 = vrot.slane %v286_v44, 1  ;;  %v857_v28 = vrot.slane %v369_v4, 1  ;;  %v956_v52 = vrot.slane %v286_v44, 2 }
  0xe9   : > { %v958_v47 = vrot.slane %v369_v4, 2  ;;  %v3529_v32 = vpack.i.bf16 %v286_v44, %v352_v2  ;;  %v2034_v0 = vunpack.i.l.bf16 %v3249_v3  ;;  %v2075_v46 = vunpack.i.h.bf16 %v3285_v55 }
  0xea   : > { %2487 = vrot.lane.b32.xlu1 %v3080_v8, %s2645_s22  ;;  %2492 = vrot.lane.b32.xlu0 %v3506_v38, %s2646_s23  ;;  %v955_v8 = vrot.slane %v352_v2, 2  ;;  %v2115_v21 = vunpack.i.h.bf16 %v3353_v39  ;;  %v2114_v4 = vunpack.i.l.bf16 %v3353_v39  ;;  %v3538_v59 = vsel %vm402_vm1, %v854_v42, %v855_v13 }
  0xeb   : > { %v3541_v44 = vsel %vm402_vm1, %v855_v13, %v857_v28  ;;  %v2155_v3 = vunpack.i.h.bf16 %v3426_v15  ;;  %v2154_v2 = vunpack.i.l.bf16 %v3426_v15  ;;  %v3551_v39 = vsel %vm579_vm2, %v956_v52, %v958_v47 }
  0xec   : > { %v3519_v34 = vpop.permute.xlu1 %2207  ;;  %v3521_v17 = vpop.permute.xlu0 %2212  ;;  %v3548_v48 = vsel %vm579_vm2, %v955_v8, %v956_v52  ;;  %v1346_v42 = vsel %vm1344_vm3, %v4050_v18, %v1995_v19  ;;  %v1345_v13 = vsel %vm1344_vm3, %v4051_v43, %v1994_v57  ;;  %v2195_v28 = vunpack.i.h.bf16 %v3490_v26 }
  0xed   : > { %v1362_v15 = vsel %vm1344_vm3, %v2848_v6, %v2035_v20  ;;  %v1361_v8 = vsel %vm1344_vm3, %v2851_v7, %v2034_v0  ;;  %v1379_v52 = vsel %vm1377_vm4, %v1346_v42, %v2075_v46  ;;  %v2210_v25 = vunpack.i.h.bf16 %v3519_v34 }
  0xee   : > { %2497 = vrot.lane.b32.xlu1 %v3177_v35, %s2646_s23  ;;  %2502 = vrot.lane.b32.xlu0 %v3018_v50, %s2647_s24  ;;  %v2074_v35 = vunpack.i.l.bf16 %v3285_v55  ;;  %v4049_v55 = vld [vmem:[#allocation13_spill] sm:$0xff]  ;;  %v1394_v57 = vsel %vm1377_vm4, %v1361_v8, %v2114_v4  ;;  %v1395_v26 = vsel %vm1377_vm4, %v1362_v15, %v2115_v21  ;;  %v2209_v24 = vunpack.i.l.bf16 %v3519_v34 }
  0xef   : > { %v1412_v7 = vsel %vm1410_vm5, %v1379_v52, %v2155_v3  ;;  %v2215_v20 = vunpack.i.h.bf16 %v3521_v17  ;;  %v2214_v0 = vunpack.i.l.bf16 %v3521_v17  ;;  %v1427_v46 = vsel %vm1410_vm5, %v1394_v57, %v2194_v45 }
  0xf0   : > { %v2218_v9 = vpop.permute.xlu1 %2217  ;;  %v2223_v60 = vpop.permute.xlu0 %2222  ;;  %v1378_v47 = vsel %vm1377_vm4, %v1345_v13, %v2074_v35  ;;  %v1428_v35 = vsel %vm1410_vm5, %v1395_v26, %v2195_v28  ;;  %v1460_v15 = vsel %vm1443_vm6, %v1427_v46, %v2209_v24 }
  0xf1   : > { %v1411_v6 = vsel %vm1410_vm5, %v1378_v47, %v2154_v2  ;;  %v2220_v21 = vunpack.i.h.bf16 %v2218_v9  ;;  %v2219_v4 = vunpack.i.l.bf16 %v2218_v9  ;;  %v2225_v34 = vunpack.i.h.bf16 %v2223_v60 }
  0xf2   : > { %2507 = vrot.lane.b32.xlu1 %v4049_v55, %s2647_s24  ;;  %2512 = vrot.lane.b32.xlu0 %v3147_v22, %s2648_s25  ;;  %v2224_v2 = vunpack.i.l.bf16 %v2223_v60  ;;  %v1461_v17 = vsel %vm1443_vm6, %v1428_v35, %v2210_v25  ;;  %v1444_v45 = vsel %vm1443_vm6, %v1411_v6, %v2214_v0  ;;  %v1445_v28 = vsel %vm1443_vm6, %v1412_v7, %v2215_v20 }
  0xf3   : > { %v1494_v60 = vsel %vm1476_vm7, %v1461_v17, %v2220_v21  ;;  %v1478_v25 = vsel %vm1476_vm7, %v1445_v28, %v2225_v34  ;;  %v2000_v28 = vunpack.i.h.bf16 %v3227_v5 }
  0xf4   : > { %v2228_v19 = vpop.permute.xlu1 %2227  ;;  %v2233_v61 = vpop.permute.xlu0 %2232 }
  0xf5   : > { %v2230_v42 = vunpack.i.h.bf16 %v2228_v19  ;;  %v2229_v3 = vunpack.i.l.bf16 %v2228_v19  ;;  %v2235_v8 = vunpack.i.h.bf16 %v2233_v61  ;;  %v2234_v52 = vunpack.i.l.bf16 %v2233_v61 }
  0xf6   : > { %2517 = vrot.lane.b32.xlu1 %v3084_v12, %s2648_s25  ;;  %2522 = vrot.lane.b32.xlu0 %v3506_v38, %s2643_s20  ;;  %v1493_v38 = vsel %vm1476_vm7, %v1460_v15, %v2219_v4  ;;  %v1477_v61 = vsel %vm1476_vm7, %v1444_v45, %v2224_v2 }
  0xf7   : > { %v1526_v26 = vsel %vm1509_vm8, %v1493_v38, %v2229_v3  ;;  %v1527_v6 = vsel %vm1509_vm8, %v1494_v60, %v2230_v42  ;;  %v1511_v20 = vsel %vm1509_vm8, %v1478_v25, %v2235_v8  ;;  %v2079_v38 = vunpack.i.l.bf16 %v3290_v10 }
  0xf8   : > { %v2238_v13 = vpop.permute.xlu1 %2237  ;;  %v2243_v47 = vpop.permute.xlu0 %2242  ;;  %v2199_v25 = vunpack.i.l.bf16 %v3508_v14 }
  0xf9   : > { %v2240_v9 = vunpack.i.h.bf16 %v2238_v13  ;;  %v2239_v57 = vunpack.i.l.bf16 %v2238_v13  ;;  %v2245_v19 = vunpack.i.h.bf16 %v2243_v47  ;;  %v2244_v24 = vunpack.i.l.bf16 %v2243_v47 }
  0xfa   : > { %2527 = vrot.lane.b32.xlu1 %v3018_v50, %s2644_s21  ;;  %2532 = vrot.lane.b32.xlu0 %v4049_v55, %s2644_s21  ;;  %v1510_v50 = vsel %vm1509_vm8, %v1477_v61, %v2234_v52  ;;  %v2160_v61 = vunpack.i.h.bf16 %v3441_v33 }
  0xfb   : > { %v1559_v55 = vsel %vm1542_vm9, %v1526_v26, %v2239_v57  ;;  %v1560_v34 = vsel %vm1542_vm9, %v1527_v6, %v2240_v9  ;;  %v1543_v2 = vsel %vm1542_vm9, %v1510_v50, %v2244_v24  ;;  %v1544_v42 = vsel %vm1542_vm9, %v1511_v20, %v2245_v19  ;;  %v4055_v26 = vld [vmem:[#allocation14_spill] sm:$0xff] }
  0xfc   : > { %v2248_v7 = vpop.permute.xlu1 %2247  ;;  %v2253_v35 = vpop.permute.xlu0 %2252  ;;  %v1999_v9 = vunpack.i.l.bf16 %v3227_v5  ;;  %v3627_v57 = vpack.i.bf16 %v3551_v39, %v3548_v48  ;;  %v2039_v5 = vunpack.i.l.bf16 %v3255_v62  ;;  %v2120_v19 = vunpack.i.h.bf16 %v3369_v27 }
  0xfd   : > { %v2250_v0 = vunpack.i.h.bf16 %v2248_v7  ;;  %v2249_v46 = vunpack.i.l.bf16 %v2248_v7  ;;  %v2255_v21 = vunpack.i.h.bf16 %v2253_v35  ;;  %v2254_v4 = vunpack.i.l.bf16 %v2253_v35 }
  0xfe   : > { %2537 = vrot.lane.b32.xlu1 %v3147_v22, %s2645_s22  ;;  %2542 = vrot.lane.b32.xlu0 %v3084_v12, %s2645_s22  ;;  %v3617_v12 = vpack.i.bf16 %v3541_v44, %v3538_v59  ;;  %v2040_v59 = vunpack.i.h.bf16 %v3255_v62  ;;  %v2080_v44 = vunpack.i.h.bf16 %v3290_v10  ;;  %v2119_v48 = vunpack.i.l.bf16 %v3369_v27  ;;  %v4054_v27 = vld [vmem:[#allocation15_spill] sm:$0xff] }
  0xff   : > { %v1592_v3 = vsel %vm1575_vm10, %v1559_v55, %v2249_v46  ;;  %v1593_v13 = vsel %vm1575_vm10, %v1560_v34, %v2250_v0  ;;  %v1576_v8 = vsel %vm1575_vm10, %v1543_v2, %v2254_v4  ;;  %v1577_v52 = vsel %vm1575_vm10, %v1544_v42, %v2255_v21 }
 0x100   : > { %v2258_v22 = vpop.permute.xlu1 %2257  ;;  %v1925_v17 = vpack.c.bf16 %v1593_v13, %v1592_v3  ;;  %v2263_v47 = vpop.permute.xlu0 %2262  ;;  %v1928_v45 = vpack.c.bf16 %v1577_v52, %v1576_v8  ;;  %v1347_v24 = vsel %vm1344_vm3, %v2734_v37, %v1999_v9  ;;  %v2159_v62 = vunpack.i.l.bf16 %v3441_v33  ;;  %v4056_v13 = vld [vmem:[#allocation27_spill] sm:$0xff] }
 0x101   : > { %v2200_v10 = vunpack.i.h.bf16 %v3508_v14  ;;  %v1364_v37 = vsel %vm1344_vm3, %v2868_v31, %v2040_v59  ;;  %v1363_v6 = vsel %vm1344_vm3, %v4055_v26, %v2039_v5  ;;  %v1380_v33 = vsel %vm1377_vm4, %v1347_v24, %v2079_v38 }
 0x102   : > { %2547 = vrot.lane.b32.xlu1 %v3529_v32, %s2646_s23  ;;  %1927 = vmatprep.subr.msk.bf16.mxu0 %vm3609_vm12, %v1925_v17  ;;  %v1397_v20 = vsel %vm1377_vm4, %v1364_v37, %v2120_v19  ;;  %v1396_v14 = vsel %vm1377_vm4, %v1363_v6, %v2119_v48  ;;  %v2260_v0 = vunpack.i.h.bf16 %v2258_v22  ;;  %v2259_v46 = vunpack.i.l.bf16 %v2258_v22 }
 0x103   : > { %2552 = vrot.lane.b32.xlu0 %v3183_v16, %s2646_s23  ;;  %1930 = vmatpush3.bf16.xpose.msk.msra.mxu0 %vm3609_vm12, %v1928_v45  ;;  %v1348_v16 = vsel %vm1344_vm3, %v2731_v36, %v2000_v28  ;;  %v2601_v36 = vpack.i.bf16 %v4050_v18, %v4051_v43  ;;  %v1413_v21 = vsel %vm1410_vm5, %v1380_v33, %v2159_v62  ;;  %v2265_v31 = vunpack.i.h.bf16 %v2263_v47  ;;  %v4060_v43 = vld [vmem:[#allocation5_spill] sm:$0xff] }
 0x104   : > { %v2268_v60 = vpop.permute.xlu1 %2267  ;;  %v2273_v39 = vpop.permute.xlu0 %2272  ;;  %v1381_v7 = vsel %vm1377_vm4, %v1348_v16, %v2080_v44  ;;  %v2264_v55 = vunpack.i.l.bf16 %v2263_v47  ;;  %v1429_v34 = vsel %vm1410_vm5, %v1396_v14, %v2199_v25  ;;  %v1430_v2 = vsel %vm1410_vm5, %v1397_v20, %v2200_v10 }
 0x105   : > { %v1414_v4 = vsel %vm1410_vm5, %v1381_v7, %v2160_v61  ;;  %v2270_v42 = vunpack.i.h.bf16 %v2268_v60  ;;  %v2269_v3 = vunpack.i.l.bf16 %v2268_v60  ;;  %v2275_v22 = vunpack.i.h.bf16 %v2273_v39 }
 0x106   : > { %2557 = vrot.lane.b32.xlu1 %v3617_v12, %s2647_s24  ;;  %v2274_v17 = vunpack.i.l.bf16 %v2273_v39  ;;  %v1462_v28 = vsel %vm1443_vm6, %v1429_v34, %v2259_v46  ;;  %v1463_v47 = vsel %vm1443_vm6, %v1430_v2, %v2260_v0  ;;  %v1446_v44 = vsel %vm1443_vm6, %v1413_v21, %v2264_v55 }
 0x107   : > { %2562 = vrot.lane.b32.xlu0 %v4054_v27, %s2647_s24  ;;  %v1447_v38 = vsel %vm1443_vm6, %v1414_v4, %v2265_v31  ;;  %v1495_v48 = vsel %vm1476_vm7, %v1462_v28, %v2269_v3  ;;  %v1496_v39 = vsel %vm1476_vm7, %v1463_v47, %v2270_v42  ;;  %v2125_v47 = vunpack.i.h.bf16 %v3371_v53 }
 0x108   : > { %v2278_v50 = vpop.permute.xlu1 %2277  ;;  %v2283_v35 = vpop.permute.xlu0 %2282  ;;  %v1479_v61 = vsel %vm1476_vm7, %v1446_v44, %v2274_v17  ;;  %v1480_v62 = vsel %vm1476_vm7, %v1447_v38, %v2275_v22  ;;  %v2204_v44 = vunpack.i.l.bf16 %v3510_v63  ;;  %v4061_v38 = vld [vmem:[#allocation29_spill] sm:$0xff] }
 0x109   : > { %v2280_v8 = vunpack.i.h.bf16 %v2278_v50  ;;  %v2279_v52 = vunpack.i.l.bf16 %v2278_v50  ;;  %v2285_v9 = vunpack.i.h.bf16 %v2283_v35  ;;  %v2284_v59 = vunpack.i.l.bf16 %v2283_v35 }
 0x10a   : > { %2567 = vrot.lane.b32.xlu1 %v3627_v57, %s2648_s25 }
 0x10b   : > { %2572 = vrot.lane.b32.xlu0 %v4056_v13, %s2648_s25  ;;  %v1528_v10 = vsel %vm1509_vm8, %v1495_v48, %v2279_v52  ;;  %v1529_v25 = vsel %vm1509_vm8, %v1496_v39, %v2280_v8  ;;  %v1513_v26 = vsel %vm1509_vm8, %v1480_v62, %v2285_v9  ;;  %v4059_v52 = vld [vmem:[#allocation22_spill] sm:$0xff]  ;;  %v2124_v9 = vunpack.i.l.bf16 %v3371_v53 }
 0x10c   : > { %v2288_v45 = vpop.permute.xlu1 %2287  ;;  %v2293_v5 = vpop.permute.xlu0 %2292  ;;  %v2205_v48 = vunpack.i.h.bf16 %v3510_v63 }
 0x10d   : > { %v2290_v60 = vunpack.i.h.bf16 %v2288_v45  ;;  %v2289_v19 = vunpack.i.l.bf16 %v2288_v45  ;;  %v2295_v16 = vunpack.i.h.bf16 %v2293_v5  ;;  %v2294_v24 = vunpack.i.l.bf16 %v2293_v5 }
 0x10e   : > { %2577 = vrot.lane.b32.xlu1 %v3529_v32, %s2643_s20  ;;  %v1512_v32 = vsel %vm1509_vm8, %v1479_v61, %v2284_v59  ;;  %v2085_v45 = vunpack.i.h.bf16 %v4059_v52  ;;  %v2164_v59 = vunpack.i.l.bf16 %v3443_v11  ;;  %v2165_v5 = vunpack.i.h.bf16 %v3443_v11  ;;  %v4064_v11 = vld [vmem:[#allocation16_spill] sm:$0xff]  ;;  %v4065_v61 = vld [vmem:[#allocation17_spill] sm:$0xff] }
 0x10f   : > { %2582 = vrot.lane.b32.xlu0 %v3617_v12, %s2644_s21  ;;  %v1561_v50 = vsel %vm1542_vm9, %v1528_v10, %v2289_v19  ;;  %v1562_v12 = vsel %vm1542_vm9, %v1529_v25, %v2290_v60  ;;  %v1545_v0 = vsel %vm1542_vm9, %v1512_v32, %v2294_v24  ;;  %v1546_v46 = vsel %vm1542_vm9, %v1513_v26, %v2295_v16  ;;  %v3725_v60 = vld [vmem:[%s3947_s1] sm:$0xff]  ;;  %v4063_v16 = vld [vmem:[#allocation4_spill] sm:$0xff] }
 0x110   : > { %v2298_v37 = vpop.permute.xlu1 %2297  ;;  %v2303_v7 = vpop.permute.xlu0 %2302  ;;  %v4062_v19 = vld [vmem:[#allocation6_spill] sm:$0xff]  ;;  %1923 = vmatprep.mubr.msk.f32.mxu0 %vm1615_vm11, %v3725_v60 }
 0x111   : > { %v2300_v6 = vunpack.i.h.bf16 %v2298_v37  ;;  %v2299_v33 = vunpack.i.l.bf16 %v2298_v37  ;;  %v2305_v20 = vunpack.i.h.bf16 %v2303_v7  ;;  %v2304_v14 = vunpack.i.l.bf16 %v2303_v7 }
 0x112   : > { %2587 = vrot.lane.b32.xlu1 %v4054_v27, %s2644_s21  ;;  %v4057_v27 = vld [vmem:[#allocation8_spill] sm:$0xff] }
 0x113   : > { %v1594_v35 = vsel %vm1575_vm10, %v1561_v50, %v2299_v33  ;;  %v1595_v21 = vsel %vm1575_vm10, %v1562_v12, %v2300_v6  ;;  %2592 = vrot.lane.b32.xlu0 %v3627_v57, %s2645_s22  ;;  %v1578_v31 = vsel %vm1575_vm10, %v1545_v0, %v2304_v14  ;;  %v1579_v55 = vsel %vm1575_vm10, %v1546_v46, %v2305_v20  ;;  %v4058_v57 = vld [vmem:[#allocation21_spill] sm:$0xff]  ;;  %v4066_v14 = vld [vmem:[#allocation18_spill] sm:$0xff] }
 0x114   : > { %v1931_v4 = vpack.c.bf16 %v1595_v21, %v1594_v35  ;;  %v2308_v34 = vpop.permute.xlu1 %2307  ;;  %v1934_v2 = vpack.c.bf16 %v1579_v55, %v1578_v31  ;;  %v2313_v42 = vpop.permute.xlu0 %2312  ;;  %v2005_v3 = vunpack.i.h.bf16 %v4057_v27  ;;  %v2004_v22 = vunpack.i.l.bf16 %v4057_v27 }
 0x115   : > { %v2045_v17 = vunpack.i.h.bf16 %v4058_v57  ;;  %v2044_v8 = vunpack.i.l.bf16 %v4058_v57  ;;  %v2309_v39 = vunpack.i.l.bf16 %v2308_v34  ;;  %v2310_v6 = vunpack.i.h.bf16 %v2308_v34 }
 0x116   : > { %2597 = vrot.lane.b32.xlu1 %v4056_v13, %s2645_s22  ;;  %1933 = vmatprep.subr.msk.bf16.mxu0 %vm3609_vm12, %v1931_v4  ;;  %v2084_v13 = vunpack.i.l.bf16 %v4059_v52  ;;  %v1349_v53 = vsel %vm1344_vm3, %v4062_v19, %v2004_v22  ;;  %v2315_v12 = vunpack.i.h.bf16 %v2313_v42  ;;  %v2314_v20 = vunpack.i.l.bf16 %v2313_v42  ;;  %v4067_v4 = vld [vmem:[#allocation25_spill] sm:$0xff] }
 0x117   : > { %2602 = vrot.lane.b32.xlu0 %v2601_v36, %s2646_s23  ;;  %1936 = vmatpush3.bf16.xpose.msk.msra.mxu0 %vm3609_vm12, %v1934_v2  ;;  %v1350_v36 = vsel %vm1344_vm3, %v4060_v43, %v2005_v3  ;;  %v1366_v24 = vsel %vm1344_vm3, %v4064_v11, %v2045_v17  ;;  %v1365_v62 = vsel %vm1344_vm3, %v4065_v61, %v2044_v8  ;;  %v1609_v17 = vld [vmem:[%s3948_s2] sm:$0xff] }
 0x118   : > { %v2318_v28 = vpop.permute.xlu1 %2317  ;;  %v2323_v18 = vpop.permute.xlu0 %2322  ;;  %v1383_v10 = vsel %vm1377_vm4, %v1350_v36, %v2085_v45  ;;  %v1382_v25 = vsel %vm1377_vm4, %v1349_v53, %v2084_v13  ;;  %v1398_v63 = vsel %vm1377_vm4, %v1365_v62, %v2124_v9  ;;  %v1399_v32 = vsel %vm1377_vm4, %v1366_v24, %v2125_v47 }
 0x119   : > { %v1415_v26 = vsel %vm1410_vm5, %v1382_v25, %v2164_v59  ;;  %v1416_v7 = vsel %vm1410_vm5, %v1383_v10, %v2165_v5  ;;  %v1431_v50 = vsel %vm1410_vm5, %v1398_v63, %v2204_v44  ;;  %v1432_v0 = vsel %vm1410_vm5, %v1399_v32, %v2205_v48 }
 0x11a   : > { %2607 = vrot.lane.b32.xlu1 %v4061_v38, %s2646_s23  ;;  %v1464_v46 = vsel %vm1443_vm6, %v1431_v50, %v2309_v39  ;;  %v2320_v35 = vunpack.i.h.bf16 %v2318_v28  ;;  %v2319_v21 = vunpack.i.l.bf16 %v2318_v28  ;;  %v2325_v31 = vunpack.i.h.bf16 %v2323_v18  ;;  %v4068_v28 = vld [vmem:[#allocation28_spill] sm:$0xff] }
 0x11b   : > { %2612 = vrot.lane.b32.xlu0 %v4063_v16, %s2647_s24  ;;  %v2324_v55 = vunpack.i.l.bf16 %v2323_v18  ;;  %v1465_v3 = vsel %vm1443_vm6, %v1432_v0, %v2310_v6  ;;  %v1448_v8 = vsel %vm1443_vm6, %v1415_v26, %v2314_v20  ;;  %v1449_v52 = vsel %vm1443_vm6, %v1416_v7, %v2315_v12 }
 0x11c   : > { %v2328_v37 = vpop.permute.xlu1 %2327  ;;  %v2333_v33 = vpop.permute.xlu0 %2332  ;;  %v2649_v47 = vmov 0   ;;  %v1497_v9 = vsel %vm1476_vm7, %v1464_v46, %v2319_v21  ;;  %v1498_v59 = vsel %vm1476_vm7, %v1465_v3, %v2320_v35  ;;  %v1482_v5 = vsel %vm1476_vm7, %v1449_v52, %v2325_v31  ;;  %v4071_v3 = vld [vmem:[#allocation20_spill] sm:$0xff] }
 0x11d   : > { %v2330_v34 = vunpack.i.h.bf16 %v2328_v37  ;;  %v2329_v2 = vunpack.i.l.bf16 %v2328_v37  ;;  %v2335_v42 = vunpack.i.h.bf16 %v2333_v33  ;;  %v2334_v22 = vunpack.i.l.bf16 %v2333_v33  ;;  %2631 = vset.pattern.permute.xlu0 %v2649_v47 }
 0x11e   : > { %2617 = vrot.lane.b32.xlu1 %v4066_v14, %s2647_s24  ;;  %v1481_v36 = vsel %vm1476_vm7, %v1448_v8, %v2324_v55  ;;  %v4069_v14 = vld [vmem:[#allocation7_spill] sm:$0xff]  ;;  %v2130_v21 = vunpack.i.h.bf16 %v3378_v40 }
 0x11f   : > { %2622 = vrot.lane.b32.xlu0 %v4067_v4, %s2648_s25  ;;  %v1530_v44 = vsel %vm1509_vm8, %v1497_v9, %v2329_v2  ;;  %v1531_v38 = vsel %vm1509_vm8, %v1498_v59, %v2330_v34  ;;  %v1514_v53 = vsel %vm1509_vm8, %v1481_v36, %v2334_v22  ;;  %v1515_v48 = vsel %vm1509_vm8, %v1482_v5, %v2335_v42  ;;  %v4070_v2 = vld [vmem:[#allocation19_spill] sm:$0xff] }
 0x120   : > { %v2338_v27 = vpop.permute.xlu1 %2337  ;;  %v2343_v57 = vpop.permute.xlu0 %2342  ;;  %v2050_v0 = vunpack.i.h.bf16 %v4069_v14  ;;  %v2049_v46 = vunpack.i.l.bf16 %v4069_v14  ;;  %v2129_v4 = vunpack.i.l.bf16 %v3378_v40 }
 0x121   : > { %v2340_v45 = vunpack.i.h.bf16 %v2338_v27  ;;  %v2339_v13 = vunpack.i.l.bf16 %v2338_v27  ;;  %v2345_v18 = vunpack.i.h.bf16 %v2343_v57  ;;  %v2344_v43 = vunpack.i.l.bf16 %v2343_v57 }
 0x122   : > { %2627 = vrot.lane.b32.xlu1 %v4068_v28, %s2648_s25  ;;  %v1368_v27 = vsel %vm1344_vm3, %v4070_v2, %v2050_v0  ;;  %v1367_v42 = vsel %vm1344_vm3, %v4071_v3, %v2049_v46 }
 0x123   : > { %1612 = vperm.xlu0 %2631, %v1609_v17   ;;  %v1563_v24 = vsel %vm1542_vm9, %v1530_v44, %v2339_v13  ;;  %v1564_v61 = vsel %vm1542_vm9, %v1531_v38, %v2340_v45  ;;  %v1547_v25 = vsel %vm1542_vm9, %v1514_v53, %v2344_v43  ;;  %v1548_v37 = vsel %vm1542_vm9, %v1515_v48, %v2345_v18 }
 0x124   : > { %v2348_v19 = vpop.permute.xlu1 %2347  ;;  %v2353_v11 = vpop.permute.xlu0 %2352  ;;  %v1401_v57 = vsel %vm1377_vm4, %v1368_v27, %v2130_v21  ;;  %v1400_v17 = vsel %vm1377_vm4, %v1367_v42, %v2129_v4 }
 0x125   : > { %v2350_v39 = vunpack.i.h.bf16 %v2348_v19  ;;  %v2349_v16 = vunpack.i.l.bf16 %v2348_v19  ;;  %v2355_v62 = vunpack.i.h.bf16 %v2353_v11  ;;  %v2354_v10 = vunpack.i.l.bf16 %v2353_v11 }
 0x127   : > { %v1596_v63 = vsel %vm1575_vm10, %v1563_v24, %v2349_v16  ;;  %v1597_v32 = vsel %vm1575_vm10, %v1564_v61, %v2350_v39  ;;  %v1580_v6 = vsel %vm1575_vm10, %v1547_v25, %v2354_v10  ;;  %v1581_v33 = vsel %vm1575_vm10, %v1548_v37, %v2355_v62 }
 0x128   : > { %v1937_v26 = vpack.c.bf16 %v1597_v32, %v1596_v63  ;;  %v2358_v7 = vpop.permute.xlu1 %2357  ;;  %v1940_v50 = vpack.c.bf16 %v1581_v33, %v1580_v6  ;;  %v2363_v12 = vpop.permute.xlu0 %2362 }
 0x129   : > { %v2360_v31 = vunpack.i.h.bf16 %v2358_v7  ;;  %v2359_v55 = vunpack.i.l.bf16 %v2358_v7  ;;  %v2365_v8 = vunpack.i.h.bf16 %v2363_v12  ;;  %v2364_v52 = vunpack.i.l.bf16 %v2363_v12 }
 0x12a   : > { %1939 = vmatprep.subr.msk.bf16.mxu0 %vm3609_vm12, %v1937_v26 }
 0x12b   : > { %1942 = vmatpush3.bf16.xpose.msk.msra.mxu0 %vm3609_vm12, %v1940_v50  ;;  %v1433_v45 = vsel %vm1410_vm5, %v1400_v17, %v2359_v55  ;;  %v1434_v40 = vsel %vm1410_vm5, %v1401_v57, %v2360_v31 }
 0x12c   : > { %v2368_v20 = vpop.permute.xlu1 %2367  ;;  %v2373_v35 = vpop.permute.xlu0 %2372  ;;  %v1467_v36 = vsel %vm1443_vm6, %v1434_v40, %v2365_v8  ;;  %v1466_v5 = vsel %vm1443_vm6, %v1433_v45, %v2364_v52 }
 0x12d   : > { %v2375_v13 = vunpack.i.h.bf16 %v2373_v35  ;;  %v2374_v28 = vunpack.i.l.bf16 %v2373_v35  ;;  %v2369_v9 = vunpack.i.l.bf16 %v2368_v20  ;;  %v2370_v44 = vunpack.i.h.bf16 %v2368_v20 }
 0x12f   : > { %v1499_v48 = vsel %vm1476_vm7, %v1466_v5, %v2374_v28  ;;  %v1500_v39 = vsel %vm1476_vm7, %v1467_v36, %v2375_v13  ;;  %v1450_v61 = vsel %vm1443_vm6, %v3453_v1, %v2369_v9  ;;  %v1451_v33 = vsel %vm1443_vm6, %v3457_v56, %v2370_v44 }
 0x130   : > { %v2378_v34 = vpop.permute.xlu1 %2377  ;;  %v2383_v22 = vpop.permute.xlu0 %2382 }
 0x131   : > { %v2385_v59 = vunpack.i.h.bf16 %v2383_v22  ;;  %v2384_v18 = vunpack.i.l.bf16 %v2383_v22  ;;  %v2379_v38 = vunpack.i.l.bf16 %v2378_v34  ;;  %v2380_v16 = vunpack.i.h.bf16 %v2378_v34 }
 0x133   : > { %v1532_v62 = vsel %vm1509_vm8, %v1499_v48, %v2384_v18  ;;  %v1533_v10 = vsel %vm1509_vm8, %v1500_v39, %v2385_v59  ;;  %v1483_v7 = vsel %vm1476_vm7, %v1450_v61, %v2379_v38  ;;  %v1484_v1 = vsel %vm1476_vm7, %v1451_v33, %v2380_v16 }
 0x134   : > { %v2388_v47 = vpop.permute.xlu1 %2387  ;;  %v2393_v43 = vpop.permute.xlu0 %2392 }
 0x135   : > { %v2395_v19 = vunpack.i.h.bf16 %v2393_v43  ;;  %v2394_v53 = vunpack.i.l.bf16 %v2393_v43  ;;  %v2389_v11 = vunpack.i.l.bf16 %v2388_v47  ;;  %v2390_v25 = vunpack.i.h.bf16 %v2388_v47 }
 0x137   : > { %v1565_v50 = vsel %vm1542_vm9, %v1532_v62, %v2394_v53  ;;  %v1566_v12 = vsel %vm1542_vm9, %v1533_v10, %v2395_v19  ;;  %v1516_v20 = vsel %vm1509_vm8, %v1483_v7, %v2389_v11  ;;  %v1517_v35 = vsel %vm1509_vm8, %v1484_v1, %v2390_v25 }
 0x138   : > { %v2398_v24 = vpop.permute.xlu1 %2397  ;;  %v2403_v37 = vpop.permute.xlu0 %2402 }
 0x139   : > { %v2400_v63 = vunpack.i.h.bf16 %v2398_v24  ;;  %v2399_v32 = vunpack.i.l.bf16 %v2398_v24  ;;  %v2405_v26 = vunpack.i.h.bf16 %v2403_v37  ;;  %v2404_v6 = vunpack.i.l.bf16 %v2403_v37 }
 0x13b   : > { %v1598_v14 = vsel %vm1575_vm10, %v1565_v50, %v2404_v6  ;;  %v1599_v0 = vsel %vm1575_vm10, %v1566_v12, %v2405_v26  ;;  %v1549_v55 = vsel %vm1542_vm9, %v1516_v20, %v2399_v32  ;;  %v1550_v34 = vsel %vm1542_vm9, %v1517_v35, %v2400_v63 }
 0x13c   : > { %v2408_v46 = vpop.permute.xlu1 %2407  ;;  %v1943_v21 = vpack.c.bf16 %v1599_v0, %v1598_v14  ;;  %v2413_v31 = vpop.permute.xlu0 %2412 }
 0x13d   : > { %v2410_v4 = vunpack.i.h.bf16 %v2408_v46  ;;  %v2409_v56 = vunpack.i.l.bf16 %v2408_v46  ;;  %v2415_v8 = vunpack.i.h.bf16 %v2413_v31  ;;  %v2414_v52 = vunpack.i.l.bf16 %v2413_v31 }
 0x13e   : > { %1945 = vmatprep.subr.msk.bf16.mxu0 %vm3609_vm12, %v1943_v21 }
 0x13f   : > { %v1582_v2 = vsel %vm1575_vm10, %v1549_v55, %v2409_v56  ;;  %v1583_v27 = vsel %vm1575_vm10, %v1550_v34, %v2410_v4  ;;  %v1435_v59 = vsel %vm1410_vm5, %v3393_v41, %v2414_v52  ;;  %v1436_v18 = vsel %vm1410_vm5, %v3396_v54, %v2415_v8 }
 0x140   : > { %v1946_v3 = vpack.c.bf16 %v1583_v27, %v1582_v2  ;;  %v2418_v42 = vpop.permute.xlu1 %2417  ;;  %v2423_v22 = vpop.permute.xlu0 %2422 }
 0x141   : > { %v2420_v40 = vunpack.i.h.bf16 %v2418_v42  ;;  %v2419_v13 = vunpack.i.l.bf16 %v2418_v42  ;;  %v2425_v47 = vunpack.i.h.bf16 %v2423_v22  ;;  %v2424_v9 = vunpack.i.l.bf16 %v2423_v22 }
 0x142   : > { %1948 = vmatpush3.bf16.xpose.msk.msra.mxu0 %vm3609_vm12, %v1946_v3 }
 0x143   : > { %v1468_v48 = vsel %vm1443_vm6, %v1435_v59, %v2419_v13  ;;  %v1469_v39 = vsel %vm1443_vm6, %v1436_v18, %v2420_v40  ;;  %v1452_v41 = vsel %vm1443_vm6, %v3463_v58, %v2424_v9  ;;  %v1453_v54 = vsel %vm1443_vm6, %v3467_v30, %v2425_v47 }
 0x144   : > { %v2428_v57 = vpop.permute.xlu1 %2427  ;;  %v2433_v17 = vpop.permute.xlu0 %2432 }
 0x145   : > { %v2430_v43 = vunpack.i.h.bf16 %v2428_v57  ;;  %v2429_v36 = vunpack.i.l.bf16 %v2428_v57  ;;  %v2435_v5 = vunpack.i.h.bf16 %v2433_v17  ;;  %v2434_v44 = vunpack.i.l.bf16 %v2433_v17 }
 0x147   : > { %v1501_v10 = vsel %vm1476_vm7, %v1468_v48, %v2429_v36  ;;  %v1502_v25 = vsel %vm1476_vm7, %v1469_v39, %v2430_v43  ;;  %v1485_v32 = vsel %vm1476_vm7, %v1452_v41, %v2434_v44  ;;  %v1486_v26 = vsel %vm1476_vm7, %v1453_v54, %v2435_v5 }
 0x148   : > { %v2438_v45 = vpop.permute.xlu1 %2437  ;;  %v2443_v28 = vpop.permute.xlu0 %2442 }
 0x149   : > { %v2440_v38 = vunpack.i.h.bf16 %v2438_v45  ;;  %v2439_v19 = vunpack.i.l.bf16 %v2438_v45  ;;  %v2445_v16 = vunpack.i.h.bf16 %v2443_v28  ;;  %v2444_v11 = vunpack.i.l.bf16 %v2443_v28 }
 0x14b   : > { %v1534_v6 = vsel %vm1509_vm8, %v1501_v10, %v2439_v19  ;;  %v1535_v33 = vsel %vm1509_vm8, %v1502_v25, %v2440_v38  ;;  %v1518_v7 = vsel %vm1509_vm8, %v1485_v32, %v2444_v11  ;;  %v1519_v30 = vsel %vm1509_vm8, %v1486_v26, %v2445_v16 }
 0x14c   : > { %v2448_v53 = vpop.permute.xlu1 %2447  ;;  %v2453_v24 = vpop.permute.xlu0 %2452 }
 0x14d   : > { %v2450_v61 = vunpack.i.h.bf16 %v2448_v53  ;;  %v2449_v62 = vunpack.i.l.bf16 %v2448_v53  ;;  %v2455_v37 = vunpack.i.h.bf16 %v2453_v24  ;;  %v2454_v63 = vunpack.i.l.bf16 %v2453_v24 }
 0x14f   : > { %v1567_v20 = vsel %vm1542_vm9, %v1534_v6, %v2449_v62  ;;  %v1568_v14 = vsel %vm1542_vm9, %v1535_v33, %v2450_v61  ;;  %v1551_v35 = vsel %vm1542_vm9, %v1518_v7, %v2454_v63  ;;  %v1552_v21 = vsel %vm1542_vm9, %v1519_v30, %v2455_v37 }
 0x150   : > { %v2458_v58 = vpop.permute.xlu1 %2457  ;;  %v2463_v1 = vpop.permute.xlu0 %2462 }
 0x151   : > { %v2460_v50 = vunpack.i.h.bf16 %v2458_v58  ;;  %v2459_v12 = vunpack.i.l.bf16 %v2458_v58  ;;  %v2465_v0 = vunpack.i.h.bf16 %v2463_v1  ;;  %v2464_v46 = vunpack.i.l.bf16 %v2463_v1 }
 0x153   : > { %v1600_v4 = vsel %vm1575_vm10, %v1567_v20, %v2459_v12  ;;  %v1601_v56 = vsel %vm1575_vm10, %v1568_v14, %v2460_v50  ;;  %v1584_v55 = vsel %vm1575_vm10, %v1551_v35, %v2464_v46  ;;  %v1585_v34 = vsel %vm1575_vm10, %v1552_v21, %v2465_v0 }
 0x154   : > { %v1949_v31 = vpack.c.bf16 %v1601_v56, %v1600_v4  ;;  %v2468_v2 = vpop.permute.xlu1 %2467  ;;  %v1952_v27 = vpack.c.bf16 %v1585_v34, %v1584_v55  ;;  %v2473_v3 = vpop.permute.xlu0 %2472 }
 0x155   : > { %v2470_v57 = vunpack.i.h.bf16 %v2468_v2  ;;  %v2469_v17 = vunpack.i.l.bf16 %v2468_v2  ;;  %v2475_v45 = vunpack.i.h.bf16 %v2473_v3  ;;  %v2474_v40 = vunpack.i.l.bf16 %v2473_v3 }
 0x156   : > { %1951 = vmatprep.subr.msk.bf16.mxu0 %vm3609_vm12, %v1949_v31 }
 0x157   : > { %1954 = vmatpush3.bf16.xpose.msk.msra.mxu0 %vm3609_vm12, %v1952_v27  ;;  %v1437_v13 = vsel %vm1410_vm5, %v3416_v49, %v2469_v17  ;;  %v1438_v28 = vsel %vm1410_vm5, %v3413_v51, %v2470_v57 }
 0x158   : > { %v2478_v42 = vpop.permute.xlu1 %2477  ;;  %v2483_v22 = vpop.permute.xlu0 %2482  ;;  %v1471_v44 = vsel %vm1443_vm6, %v1438_v28, %v2475_v45  ;;  %v1470_v38 = vsel %vm1443_vm6, %v1437_v13, %v2474_v40  ;;  %v4072_v45 = vld [vmem:[#allocation9_spill] sm:$0xff]  ;;  %v4073_v13 = vld [vmem:[#allocation23_spill] sm:$0xff] }
 0x159   : > { %v2485_v47 = vunpack.i.h.bf16 %v2483_v22  ;;  %v2484_v9 = vunpack.i.l.bf16 %v2483_v22  ;;  %v2479_v18 = vunpack.i.l.bf16 %v2478_v42  ;;  %v2480_v19 = vunpack.i.h.bf16 %v2478_v42 }
 0x15b   : > { %v1503_v49 = vsel %vm1476_vm7, %v1470_v38, %v2484_v9  ;;  %v1504_v16 = vsel %vm1476_vm7, %v1471_v44, %v2485_v47  ;;  %v1454_v41 = vsel %vm1443_vm6, %v3472_v23, %v2479_v18  ;;  %v1455_v26 = vsel %vm1443_vm6, %v3476_v29, %v2480_v19 }
 0x15c   : > { %v2488_v8 = vpop.permute.xlu1 %2487  ;;  %v2493_v52 = vpop.permute.xlu0 %2492 }
 0x15d   : > { %v2495_v43 = vunpack.i.h.bf16 %v2493_v52  ;;  %v2494_v36 = vunpack.i.l.bf16 %v2493_v52  ;;  %v2489_v53 = vunpack.i.l.bf16 %v2488_v8  ;;  %v2490_v51 = vunpack.i.h.bf16 %v2488_v8 }
 0x15f   : > { %v1536_v54 = vsel %vm1509_vm8, %v1503_v49, %v2494_v36  ;;  %v1537_v61 = vsel %vm1509_vm8, %v1504_v16, %v2495_v43  ;;  %v1487_v6 = vsel %vm1476_vm7, %v1454_v41, %v2489_v53  ;;  %v1488_v23 = vsel %vm1476_vm7, %v1455_v26, %v2490_v51  ;;  %v4075_v16 = vld [vmem:[#allocation26_spill] sm:$0xff] }
 0x160   : > { %v2498_v59 = vpop.permute.xlu1 %2497  ;;  %v2503_v5 = vpop.permute.xlu0 %2502 }
 0x161   : > { %v2505_v48 = vunpack.i.h.bf16 %v2503_v5  ;;  %v2504_v39 = vunpack.i.l.bf16 %v2503_v5  ;;  %v2499_v11 = vunpack.i.l.bf16 %v2498_v59  ;;  %v2500_v62 = vunpack.i.h.bf16 %v2498_v59 }
 0x163   : > { %v1569_v33 = vsel %vm1542_vm9, %v1536_v54, %v2504_v39  ;;  %v1570_v58 = vsel %vm1542_vm9, %v1537_v61, %v2505_v48  ;;  %v1520_v7 = vsel %vm1509_vm8, %v1487_v6, %v2499_v11  ;;  %v1521_v1 = vsel %vm1509_vm8, %v1488_v23, %v2500_v62  ;;  %v4074_v39 = vld [vmem:[#allocation11_spill] sm:$0xff] }
 0x164   : > { %v2508_v24 = vpop.permute.xlu1 %2507  ;;  %v2513_v10 = vpop.permute.xlu0 %2512 }
 0x165   : > { %v2510_v25 = vunpack.i.h.bf16 %v2508_v24  ;;  %v2509_v37 = vunpack.i.l.bf16 %v2508_v24  ;;  %v2515_v63 = vunpack.i.h.bf16 %v2513_v10  ;;  %v2514_v32 = vunpack.i.l.bf16 %v2513_v10 }
 0x167   : > { %v1602_v30 = vsel %vm1575_vm10, %v1569_v33, %v2514_v32  ;;  %v1603_v50 = vsel %vm1575_vm10, %v1570_v58, %v2515_v63  ;;  %v1553_v46 = vsel %vm1542_vm9, %v1520_v7, %v2509_v37  ;;  %v1554_v35 = vsel %vm1542_vm9, %v1521_v1, %v2510_v25 }
 0x168   : > { %v2518_v12 = vpop.permute.xlu1 %2517  ;;  %v1955_v20 = vpack.c.bf16 %v1603_v50, %v1602_v30  ;;  %v2523_v0 = vpop.permute.xlu0 %2522 }
 0x169   : > { %v2520_v14 = vunpack.i.h.bf16 %v2518_v12  ;;  %v2519_v29 = vunpack.i.l.bf16 %v2518_v12  ;;  %v2525_v27 = vunpack.i.h.bf16 %v2523_v0  ;;  %v2524_v3 = vunpack.i.l.bf16 %v2523_v0 }
 0x16a   : > { %1957 = vmatprep.subr.msk.bf16.mxu0 %vm3609_vm12, %v1955_v20 }
 0x16b   : > { %v1586_v21 = vsel %vm1575_vm10, %v1553_v46, %v2519_v29  ;;  %v1587_v4 = vsel %vm1575_vm10, %v1554_v35, %v2520_v14  ;;  %v1439_v40 = vsel %vm1410_vm5, %v4072_v45, %v2524_v3  ;;  %v1440_v28 = vsel %vm1410_vm5, %v4073_v13, %v2525_v27 }
 0x16c   : > { %v1958_v56 = vpack.c.bf16 %v1587_v4, %v1586_v21  ;;  %v2528_v31 = vpop.permute.xlu1 %2527  ;;  %v2533_v55 = vpop.permute.xlu0 %2532 }
 0x16d   : > { %v2530_v22 = vunpack.i.h.bf16 %v2528_v31  ;;  %v2529_v57 = vunpack.i.l.bf16 %v2528_v31  ;;  %v2535_v8 = vunpack.i.h.bf16 %v2533_v55  ;;  %v2534_v52 = vunpack.i.l.bf16 %v2533_v55 }
 0x16e   : > { %1960 = vmatpush3.bf16.xpose.msk.msra.mxu0 %vm3609_vm12, %v1958_v56 }
 0x16f   : > { %v1472_v44 = vsel %vm1443_vm6, %v1439_v40, %v2529_v57  ;;  %v1473_v38 = vsel %vm1443_vm6, %v1440_v28, %v2530_v22  ;;  %v1456_v49 = vsel %vm1443_vm6, %v4074_v39, %v2534_v52  ;;  %v1457_v51 = vsel %vm1443_vm6, %v4075_v16, %v2535_v8  ;;  %v4076_v57 = vld [vmem:[#allocation24_spill] sm:$0xff]  ;;  %v4077_v8 = vld [vmem:[#allocation10_spill] sm:$0xff] }
 0x170   : > { %v2538_v34 = vpop.permute.xlu1 %2537  ;;  %v2543_v2 = vpop.permute.xlu0 %2542  ;;  %v4078_v16 = vld [vmem:[#allocation12_spill] sm:$0xff] }
 0x171   : > { %v2540_v47 = vunpack.i.h.bf16 %v2538_v34  ;;  %v2539_v9 = vunpack.i.l.bf16 %v2538_v34  ;;  %v2545_v59 = vunpack.i.h.bf16 %v2543_v2  ;;  %v2544_v18 = vunpack.i.l.bf16 %v2543_v2 }
 0x173   : > { %v1505_v41 = vsel %vm1476_vm7, %v1472_v44, %v2539_v9  ;;  %v1506_v54 = vsel %vm1476_vm7, %v1473_v38, %v2540_v47  ;;  %v1489_v10 = vsel %vm1476_vm7, %v1456_v49, %v2544_v18  ;;  %v1490_v25 = vsel %vm1476_vm7, %v1457_v51, %v2545_v59 }
 0x174   : > { %v2548_v42 = vpop.permute.xlu1 %2547 }
 0x175   : > { %v2553_v17 = vpop.permute.xlu0 %2552  ;;  %v2550_v43 = vunpack.i.h.bf16 %v2548_v42  ;;  %v2549_v36 = vunpack.i.l.bf16 %v2548_v42 }
 0x176   : > { %v2555_v19 = vunpack.i.h.bf16 %v2553_v17  ;;  %v2554_v53 = vunpack.i.l.bf16 %v2553_v17 }
 0x177   : > { %v1538_v37 = vsel %vm1509_vm8, %v1505_v41, %v2549_v36  ;;  %v1539_v63 = vsel %vm1509_vm8, %v1506_v54, %v2550_v43 }
 0x178   : > { %v2558_v5 = vpop.permute.xlu1 %2557  ;;  %v1522_v26 = vsel %vm1509_vm8, %v1489_v10, %v2554_v53  ;;  %v1523_v6 = vsel %vm1509_vm8, %v1490_v25, %v2555_v19 }
 0x179   : > { %v2563_v48 = vpop.permute.xlu0 %2562  ;;  %v2560_v11 = vunpack.i.h.bf16 %v2558_v5  ;;  %v2559_v24 = vunpack.i.l.bf16 %v2558_v5 }
 0x17a   : > { %v2565_v61 = vunpack.i.h.bf16 %v2563_v48  ;;  %v2564_v62 = vunpack.i.l.bf16 %v2563_v48 }
 0x17b   : > { %v1571_v7 = vsel %vm1542_vm9, %v1538_v37, %v2559_v24  ;;  %v1572_v30 = vsel %vm1542_vm9, %v1539_v63, %v2560_v11  ;;  %v4079_v37 = vld [vmem:[#allocation30_spill] sm:$0xff] }
 0x17c   : > { %v2568_v32 = vpop.permute.xlu1 %2567  ;;  %v1555_v1 = vsel %vm1542_vm9, %v1522_v26, %v2564_v62  ;;  %v1556_v20 = vsel %vm1542_vm9, %v1523_v6, %v2565_v61 }
 0x17d   : > { %v2570_v33 = vunpack.i.h.bf16 %v2568_v32  ;;  %v2569_v58 = vunpack.i.l.bf16 %v2568_v32  ;;  %v2573_v23 = vpop.permute.xlu0 %2572 }
 0x17e   : > { %v2575_v50 = vunpack.i.h.bf16 %v2573_v23  ;;  %v2574_v12 = vunpack.i.l.bf16 %v2573_v23 }
 0x17f   : > { %v1604_v14 = vsel %vm1575_vm10, %v1571_v7, %v2569_v58  ;;  %v1605_v29 = vsel %vm1575_vm10, %v1572_v30, %v2570_v33 }
 0x180   : > { %v1961_v0 = vpack.c.bf16 %v1605_v29, %v1604_v14  ;;  %v1588_v46 = vsel %vm1575_vm10, %v1555_v1, %v2574_v12  ;;  %v1589_v35 = vsel %vm1575_vm10, %v1556_v20, %v2575_v50  ;;  %v2578_v21 = vpop.permute.xlu1 %2577 }
 0x181   : > { %v1964_v4 = vpack.c.bf16 %v1589_v35, %v1588_v46  ;;  %v2583_v56 = vpop.permute.xlu0 %2582  ;;  %v2580_v34 = vunpack.i.h.bf16 %v2578_v21  ;;  %v2579_v2 = vunpack.i.l.bf16 %v2578_v21 }
 0x182   : > { %1963 = vmatprep.subr.msk.bf16.mxu0 %vm3609_vm12, %v1961_v0  ;;  %v2585_v42 = vunpack.i.h.bf16 %v2583_v56  ;;  %v2584_v22 = vunpack.i.l.bf16 %v2583_v56 }
 0x183   : > { %1966 = vmatpush3.bf16.xpose.msk.msra.mxu0 %vm3609_vm12, %v1964_v4  ;;  %v1441_v17 = vsel %vm1410_vm5, %v4076_v57, %v2579_v2  ;;  %v1442_v52 = vsel %vm1410_vm5, %v4077_v8, %v2580_v34 }
 0x184   : > { %v2588_v31 = vpop.permute.xlu1 %2587  ;;  %v1475_v18 = vsel %vm1443_vm6, %v1442_v52, %v2585_v42  ;;  %v1474_v43 = vsel %vm1443_vm6, %v1441_v17, %v2584_v22 }
 0x185   : > { %v2593_v55 = vpop.permute.xlu0 %2592  ;;  %v2589_v28 = vunpack.i.l.bf16 %v2588_v31  ;;  %v2590_v36 = vunpack.i.h.bf16 %v2588_v31 }
 0x186   : > { %v2595_v45 = vunpack.i.h.bf16 %v2593_v55  ;;  %v2594_v40 = vunpack.i.l.bf16 %v2593_v55 }
 0x187   : > { %v1458_v51 = vsel %vm1443_vm6, %v4078_v16, %v2589_v28  ;;  %v1459_v63 = vsel %vm1443_vm6, %v4079_v37, %v2590_v36 }
 0x188   : > { %v2598_v27 = vpop.permute.xlu1 %2597  ;;  %v1507_v19 = vsel %vm1476_vm7, %v1474_v43, %v2594_v40  ;;  %v1508_v53 = vsel %vm1476_vm7, %v1475_v18, %v2595_v45 }
 0x189   : > { %v2603_v3 = vpop.permute.xlu0 %2602  ;;  %v2599_v5 = vunpack.i.l.bf16 %v2598_v27  ;;  %v2600_v48 = vunpack.i.h.bf16 %v2598_v27 }
 0x18a   : > { %v2605_v47 = vunpack.i.h.bf16 %v2603_v3  ;;  %v2604_v9 = vunpack.i.l.bf16 %v2603_v3 }
 0x18b   : > { %v1491_v32 = vsel %vm1476_vm7, %v1458_v51, %v2599_v5  ;;  %v1492_v33 = vsel %vm1476_vm7, %v1459_v63, %v2600_v48 }
 0x18c   : > { %v2608_v13 = vpop.permute.xlu1 %2607  ;;  %v1540_v11 = vsel %vm1509_vm8, %v1507_v19, %v2604_v9  ;;  %v1541_v24 = vsel %vm1509_vm8, %v1508_v53, %v2605_v47 }
 0x18d   : > { %v2613_v59 = vpop.permute.xlu0 %2612  ;;  %v2609_v39 = vunpack.i.l.bf16 %v2608_v13  ;;  %v2610_v41 = vunpack.i.h.bf16 %v2608_v13 }
 0x18e   : > { %v2615_v44 = vunpack.i.h.bf16 %v2613_v59  ;;  %v2614_v38 = vunpack.i.l.bf16 %v2613_v59 }
 0x18f   : > { %v1524_v58 = vsel %vm1509_vm8, %v1491_v32, %v2609_v39  ;;  %v1525_v50 = vsel %vm1509_vm8, %v1492_v33, %v2610_v41 }
 0x190   : > { %v2618_v49 = vpop.permute.xlu1 %2617  ;;  %v1573_v26 = vsel %vm1542_vm9, %v1540_v11, %v2614_v38  ;;  %v1574_v6 = vsel %vm1542_vm9, %v1541_v24, %v2615_v44 }
 0x191   : > { %v2623_v54 = vpop.permute.xlu0 %2622  ;;  %v2620_v61 = vunpack.i.h.bf16 %v2618_v49  ;;  %v2619_v62 = vunpack.i.l.bf16 %v2618_v49 }
 0x192   : > { %v2625_v10 = vunpack.i.h.bf16 %v2623_v54  ;;  %v2624_v25 = vunpack.i.l.bf16 %v2623_v54 }
 0x193   : > { %v1557_v14 = vsel %vm1542_vm9, %v1524_v58, %v2619_v62  ;;  %v1558_v29 = vsel %vm1542_vm9, %v1525_v50, %v2620_v61 }
 0x194   : > { %v1606_v23 = vsel %vm1575_vm10, %v1573_v26, %v2624_v25  ;;  %v1607_v7 = vsel %vm1575_vm10, %v1574_v6, %v2625_v10  ;;  %v2628_v30 = vpop.permute.xlu1 %2627 }
 0x195   : > { %v1967_v12 = vpack.c.bf16 %v1607_v7, %v1606_v23  ;;  %v2630_v1 = vunpack.i.h.bf16 %v2628_v30  ;;  %v2629_v20 = vunpack.i.l.bf16 %v2628_v30 }
 0x197   : > { %v1590_v0 = vsel %vm1575_vm10, %v1557_v14, %v2629_v20  ;;  %v1591_v46 = vsel %vm1575_vm10, %v1558_v29, %v2630_v1  ;;  %1969 = vmatprep.subr.msk.bf16.mxu0 %vm3609_vm12, %v1967_v12 }
 0x198   : > { %v1970_v35 = vpack.c.bf16 %v1591_v46, %v1590_v0 }
 0x19a   : > { %1972 = vmatpush3.bf16.xpose.msk.msra.mxu0 %vm3609_vm12, %v1970_v35 }
 0x1a1   : > { %1924 = vmatmul.mubr.msk.f32.vlgmr.msra.gmra.mrb[0].mxu0 %vm1615_vm11, %v3725_v60 }
 0x1a2   : > { %v1613_v21 = vpop.permute.xlu0 %1612 }
 0x274   : > { %v1781_v4 = vpop.f32.mrb[0].mxu0 }
 0x275   : > { %v1782_v56 = vadd.f32 %v1781_v4, %v1613_v21  ;;  %v1783_v31 = vpop.f32.mrb[1].mxu0 }
 0x276   : > { %v1784_v55 = vadd.f32 %v1783_v31, %v1613_v21 }
 0x277   : > { %v1786_v34 = vmax.f32 %v1782_v56, 0.0 }
 0x278   : > { %v1787_v2 = vmax.f32 %v1784_v55, 0.0 }
 0x279   : > { %1788 = vst [vmem:[%s170_s6] sm:$0xff] %v1786_v34 }
 0x27a   : > { %1789 = vst [vmem:[%s170_s6 + $0x8] sm:$0xff] %v1787_v2 }
 0x27b PF: > { %s13_s12 = sadd.s32 1, %s2638_s12  }
 0x27c   : > { %p10_p4 = scmp.ge.s32.totalorder %s13_s12, 4  }
 0x27e   :  { %12 = sbr.rel (!%p10_p4) target bundleno = 1 (0x1), region = 62 }

</bundles_post_ra>
